<compile_context>
chip_gen: v5e
topology: v5e:2x2
jax: 0.10.0
libtpu: 0.0.40
codegen_flags: <defaults>
</compile_context>

<pallas_src>
import functools

import jax
import jax.numpy as jnp
from jax import lax
from jax.experimental import pallas as pl
from jax.experimental.pallas import tpu as pltpu


# -----------------------------------------------------------------------------
# Pallas kernel: fused global average pool + 3 linear heads (concatenated).
#   grid = (B // b_tile, HW // hw_tile)   -- HW is the reduction axis (last).
#   fmap block  : (b_tile, hw_tile, C)   bf16
#   w_cat block : (C, Ntot)              bf16   (resident: same block every step)
#   b_cat block : (1, Ntot)              f32    (resident)
#   out block   : (b_tile, Ntot)         f32    (resident across the HW axis)
#   scratch     : (b_tile, C)            f32 running-sum accumulator
# -----------------------------------------------------------------------------
def _pool_heads_kernel(fmap_ref, w_ref, b_ref, out_ref, acc_ref, *, inv_hw):
    k = pl.program_id(1)

    @pl.when(k == 0)
    def _init():
        acc_ref[...] = jnp.zeros_like(acc_ref)

    # Partial spatial sum for this HW tile, accumulated in f32 (XLU reduce over
    # the sublane axis; lanes stay on C).
    acc_ref[...] += jnp.sum(fmap_ref[...].astype(jnp.float32), axis=1)

    @pl.when(k == pl.num_programs(1) - 1)
    def _finalize():
        pooled = (acc_ref[...] * inv_hw).astype(w_ref.dtype)       # (b_tile, C) bf16
        logits = jnp.dot(pooled, w_ref[...],                       # MXU, f32 acc
                         preferred_element_type=jnp.float32)
        out_ref[...] = (logits + b_ref[...]).astype(out_ref.dtype)


def _pick_tiles(B, HW, C, itemsize, budget_bytes=8 * 2**20):
    """Pick (b_tile, hw_tile) so one fmap buffer fits the per-buffer VMEM budget.

    Legality: hw_tile must be a multiple of 8 or equal the full HW extent;
    b_tile (2nd-minor dim of the output block) must be a multiple of 8 or equal B.
    """
    b_tile = B
    for t in (256, 128, 64, 32, 16, 8):
        if B > t and B % t == 0:
            b_tile = t
            break

    hw_tile = HW
    if HW % 8 == 0:
        candidates = [t for t in range(8, HW + 1, 8) if HW % t == 0]
        fitting = [t for t in candidates if b_tile * t * C * itemsize <= budget_bytes]
        hw_tile = max(fitting) if fitting else min(candidates)
    return b_tile, hw_tile


def pool_and_heads(fmap_flat, w_cat, b_cat):
    """fmap_flat: (B, HW, C) bf16; w_cat: (C, Ntot) bf16; b_cat: (1, Ntot) f32.

    Returns logits (B, Ntot) f32, where Ntot is padded to a multiple of 128.
    """
    B, HW, C = fmap_flat.shape
    Cw, Ntot = w_cat.shape
    assert Cw == C and Ntot % 128 == 0 and C % 128 == 0

    b_tile, hw_tile = _pick_tiles(B, HW, C, fmap_flat.dtype.itemsize)
    grid = (B // b_tile, HW // hw_tile)

    # Explicit VMEM budget: double-buffered fmap + resident weights/bias + out + acc.
    fmap_buf = b_tile * hw_tile * C * fmap_flat.dtype.itemsize
    need = (2 * fmap_buf
            + 2 * C * Ntot * w_cat.dtype.itemsize
            + 2 * Ntot * 4
            + 2 * b_tile * Ntot * 4
            + b_tile * C * 4)
    vmem_limit = int(min(96 * 2**20, max(4 * 2**20, 2 * need)))

    kernel = functools.partial(_pool_heads_kernel, inv_hw=1.0 / HW)

    cost = pl.CostEstimate(
        flops=2 * B * C * Ntot + B * HW * C,
        transcendentals=0,
        bytes_accessed=(B * HW * C * fmap_flat.dtype.itemsize
                        + C * Ntot * w_cat.dtype.itemsize
                        + B * Ntot * 4),
    )

    return pl.pallas_call(
        kernel,
        out_shape=jax.ShapeDtypeStruct((B, Ntot), jnp.float32),
        grid_spec=pltpu.PrefetchScalarGridSpec(
            num_scalar_prefetch=0,
            grid=grid,
            in_specs=[
                pl.BlockSpec((b_tile, hw_tile, C), lambda i, k: (i, k, 0)),
                pl.BlockSpec((C, Ntot), lambda i, k: (0, 0)),
                pl.BlockSpec((1, Ntot), lambda i, k: (0, 0)),
            ],
            out_specs=pl.BlockSpec((b_tile, Ntot), lambda i, k: (i, 0)),
            scratch_shapes=[pltpu.VMEM((b_tile, C), jnp.float32)],
        ),
        compiler_params=pltpu.CompilerParams(
            dimension_semantics=("parallel", "arbitrary"),
            vmem_limit_bytes=vmem_limit,
        ),
        cost_estimate=cost,
    )(fmap_flat, w_cat, b_cat)


# -----------------------------------------------------------------------------
# Plain-JAX ResNet-50 backbone in NHWC (deterministic synthetic weights).
# -----------------------------------------------------------------------------
def _conv_w(key, out_c, in_c, k):
    fan_in = in_c * k * k
    std = (2.0 / fan_in) ** 0.5
    return std * jax.random.normal(key, (k, k, in_c, out_c), jnp.float32)  # HWIO


def _bn_params(c):
    return dict(gamma=jnp.ones((c,), jnp.float32),
                beta=jnp.zeros((c,), jnp.float32),
                mean=jnp.zeros((c,), jnp.float32),
                var=jnp.ones((c,), jnp.float32))


def batchnorm(x, p, eps=1e-5):
    g = p['gamma'][None, None, None, :]
    b = p['beta'][None, None, None, :]
    m = p['mean'][None, None, None, :]
    v = p['var'][None, None, None, :]
    return (x - m) * lax.rsqrt(v + eps) * g + b


def conv2d(x, w, stride=1, padding=0):
    return lax.conv_general_dilated(
        x, w, window_strides=(stride, stride),
        padding=[(padding, padding), (padding, padding)],
        dimension_numbers=('NHWC', 'HWIO', 'NHWC'))


def maxpool_3x3_s2(x):
    return lax.reduce_window(x, -jnp.inf, lax.max,
                             (1, 3, 3, 1), (1, 2, 2, 1),
                             padding=[(0, 0), (1, 1), (1, 1), (0, 0)])


def init_bottleneck(key, in_c, width, stride):
    keys = jax.random.split(key, 4)
    p = {
        'conv1': _conv_w(keys[0], width, in_c, 1), 'bn1': _bn_params(width),
        'conv2': _conv_w(keys[1], width, width, 3), 'bn2': _bn_params(width),
        'conv3': _conv_w(keys[2], width * 4, width, 1), 'bn3': _bn_params(width * 4),
    }
    if stride != 1 or in_c != width * 4:
        p['down_conv'] = _conv_w(keys[3], width * 4, in_c, 1)
        p['down_bn'] = _bn_params(width * 4)
    return p


def bottleneck_fwd(x, p, stride):
    identity = x
    out = jax.nn.relu(batchnorm(conv2d(x, p['conv1']), p['bn1']))
    out = jax.nn.relu(batchnorm(conv2d(out, p['conv2'], stride=stride, padding=1), p['bn2']))
    out = batchnorm(conv2d(out, p['conv3']), p['bn3'])
    if 'down_conv' in p:
        identity = batchnorm(conv2d(x, p['down_conv'], stride=stride), p['down_bn'])
    return jax.nn.relu(out + identity)


def init_resnet50(key):
    layers_cfg = [(64, 3, 1), (128, 4, 2), (256, 6, 2), (512, 3, 2)]
    n_blocks_total = sum(n for _, n, _ in layers_cfg)
    keys = jax.random.split(key, 2 + n_blocks_total)
    params = {'stem_conv': _conv_w(keys[0], 64, 3, 7), 'stem_bn': _bn_params(64)}
    blocks, strides = [], []
    in_c, ki = 64, 1
    for width, n_blocks, first_stride in layers_cfg:
        for b in range(n_blocks):
            stride = first_stride if b == 0 else 1
            blocks.append(init_bottleneck(keys[ki], in_c, width, stride))
            strides.append(stride)
            in_c = width * 4
            ki += 1
    params['blocks'] = blocks
    return params, tuple(strides)   # strides kept static (outside the jit pytree)


def resnet50_feature_map(x_nhwc, params, strides):
    x = jax.nn.relu(batchnorm(conv2d(x_nhwc, params['stem_conv'], stride=2, padding=3),
                              params['stem_bn']))
    x = maxpool_3x3_s2(x)
    for p, s in zip(params['blocks'], strides):
        x = bottleneck_fwd(x, p, s)
    return x  # (B, H', W', 2048)


# -----------------------------------------------------------------------------
# BSN heads + forward.
# -----------------------------------------------------------------------------
def init_linear(key, in_f, out_f):
    kw, kb = jax.random.split(key)
    bound = 1.0 / (in_f ** 0.5)
    w = jax.random.uniform(kw, (out_f, in_f), jnp.float32, -bound, bound)
    b = jax.random.uniform(kb, (out_f,), jnp.float32, -bound, bound)
    return w, b


def bsn_forward(x_nchw, backbone_params, w_cat, b_cat, *, strides, splits):
    # Module interface is NCHW (PyTorch); backbone runs NHWC internally.
    x = jnp.transpose(x_nchw, (0, 2, 3, 1))                       # tiny 3-channel input
    fmap = resnet50_feature_map(x, backbone_params, strides)      # (B, H, W, 2048)
    B, H, W, C = fmap.shape
    # Channels already last -> flatten is free; bf16 halves the kernel's HBM read.
    fmap_flat = fmap.reshape(B, H * W, C).astype(jnp.bfloat16)
    logits = pool_and_heads(fmap_flat, w_cat, b_cat)              # (B, Ntot_padded)
    n_super, n_sub, n_target = splits
    super_logits = logits[:, :n_super]
    sub_logits = logits[:, n_super:n_super + n_sub]
    target_logits = logits[:, n_super + n_sub:n_super + n_sub + n_target]
    return target_logits, sub_logits, super_logits                # PyTorch return order


if __name__ == "__main__":
    num_superclasses, num_subclasses, num_targetclasses = 4, 8, 16
    num_features = 2048  # resnet50 fc.in_features
    splits = (num_superclasses, num_subclasses, num_targetclasses)

    root = jax.random.PRNGKey(0)
    k_backbone, k_super, k_sub, k_target, k_x = jax.random.split(root, 5)

    backbone_params, block_strides = init_resnet50(k_backbone)
    w_super, b_super = init_linear(k_super, num_features, num_superclasses)
    w_sub, b_sub = init_linear(k_sub, num_features, num_subclasses)
    w_target, b_target = init_linear(k_target, num_features, num_targetclasses)

    # Concatenate the three heads [super | sub | target]; zero-pad the output
    # axis to a multiple of 128 for a lane-dense kernel output, cast weights to bf16.
    n_real = sum(splits)
    n_pad = ((n_real + 127) // 128) * 128
    w_cat = jnp.concatenate([w_super.T, w_sub.T, w_target.T], axis=1)        # (2048, 28)
    w_cat = jnp.pad(w_cat, ((0, 0), (0, n_pad - n_real))).astype(jnp.bfloat16)
    b_cat = jnp.pad(jnp.concatenate([b_super, b_sub, b_target]),
                    (0, n_pad - n_real)).astype(jnp.float32)[None, :]

    x = jax.random.normal(k_x, (2, 3, 64, 64), jnp.float32)   # small NCHW image batch

    fwd = jax.jit(functools.partial(bsn_forward, strides=block_strides, splits=splits))
    target_logits, sub_logits, super_logits = fwd(x, backbone_params, w_cat, b_cat)

    jax.block_until_ready((target_logits, sub_logits, super_logits))
    assert target_logits.shape == (2, num_targetclasses)
    assert sub_logits.shape == (2, num_subclasses)
    assert super_logits.shape == (2, num_superclasses)
    print("KERNEL_OK")
</pallas_src>

<mosaic_0001>
module attributes {stable_mosaic.version = 11 : i64} {
  func.func @_pool_heads_kernel(%arg0: i32, %arg1: i32, %arg2: memref<2x4x2048xbf16, #tpu.memory_space<vmem>>, %arg3: memref<2048x128xbf16, #tpu.memory_space<vmem>>, %arg4: memref<1x128xf32, #tpu.memory_space<vmem>>, %arg5: memref<2x128xf32, #tpu.memory_space<vmem>>, %arg6: memref<2x2048xf32, #tpu.memory_space<vmem>>) attributes {dimension_semantics = [#tpu.dimension_semantics<parallel>, #tpu.dimension_semantics<arbitrary>], iteration_bounds = array<i64: 1, 1>, scalar_prefetch = 0 : i64, scratch_operands = 1 : i64, tpu.core_type = #tpu.core_type<tc>, window_params = [{transform_indices = @transform_0, window_bounds = array<i64: 2, 4, 2048>}, {pipeline_mode = #tpu.pipeline_mode<synchronous>, transform_indices = @transform_1, window_bounds = array<i64: 2048, 128>}, {pipeline_mode = #tpu.pipeline_mode<synchronous>, transform_indices = @transform_2, window_bounds = array<i64: 1, 128>}, {transform_indices = @transform_3, window_bounds = array<i64: 2, 128>}]} {
    %c0_i32 = arith.constant 0 : i32
    %0 = arith.cmpi eq, %arg1, %c0_i32 : i32
    %1 = arith.extui %0 : i1 to i32
    %c0_i32_0 = arith.constant 0 : i32
    %2 = arith.cmpi ne, %1, %c0_i32_0 : i32
    scf.if %2 {
      %cst_9 = arith.constant 0.000000e+00 : f32
      %12 = vector.broadcast %cst_9 : f32 to vector<2x2048xf32>
      %c0_10 = arith.constant 0 : index
      %c0_11 = arith.constant 0 : index
      %13 = vector.load %arg6[%c0_10, %c0_11] : memref<2x2048xf32, #tpu.memory_space<vmem>>, vector<2x2048xf32>
      tpu.vector_store %arg6[%c0_10, %c0_11], %12 {strides = array<i32>} : memref<2x2048xf32, #tpu.memory_space<vmem>>, vector<2x2048xf32>,
    } else {
    }
    %c0 = arith.constant 0 : index
    %c0_1 = arith.constant 0 : index
    %3 = vector.load %arg6[%c0, %c0_1] : memref<2x2048xf32, #tpu.memory_space<vmem>>, vector<2x2048xf32>
    %c0_2 = arith.constant 0 : index
    %c0_3 = arith.constant 0 : index
    %c0_4 = arith.constant 0 : index
    %4 = vector.load %arg2[%c0_2, %c0_3, %c0_4] : memref<2x4x2048xbf16, #tpu.memory_space<vmem>>, vector<2x4x2048xbf16>
    %5 = arith.extf %4 : vector<2x4x2048xbf16> to vector<2x4x2048xf32>
    %cst = arith.constant dense<0.000000e+00> : vector<2x2048xf32>
    %6 = vector.multi_reduction <add>, %5, %cst [1] : vector<2x4x2048xf32> to vector<2x2048xf32>
    %7 = arith.addf %3, %6 : vector<2x2048xf32>
    %c0_5 = arith.constant 0 : index
    %c0_6 = arith.constant 0 : index
    %8 = vector.load %arg6[%c0_5, %c0_6] : memref<2x2048xf32, #tpu.memory_space<vmem>>, vector<2x2048xf32>
    tpu.vector_store %arg6[%c0_5, %c0_6], %7 {strides = array<i32>} : memref<2x2048xf32, #tpu.memory_space<vmem>>, vector<2x2048xf32>,
    %c0_i32_7 = arith.constant 0 : i32
    %9 = arith.cmpi eq, %arg1, %c0_i32_7 : i32
    %10 = arith.extui %9 : i1 to i32
    %c0_i32_8 = arith.constant 0 : i32
    %11 = arith.cmpi ne, %10, %c0_i32_8 : i32
    scf.if %11 {
      %c0_9 = arith.constant 0 : index
      %c0_10 = arith.constant 0 : index
      %12 = vector.load %arg6[%c0_9, %c0_10] : memref<2x2048xf32, #tpu.memory_space<vmem>>, vector<2x2048xf32>
      %cst_11 = arith.constant 2.500000e-01 : f32
      %13 = vector.broadcast %cst_11 : f32 to vector<2x2048xf32>
      %14 = arith.mulf %12, %13 : vector<2x2048xf32>
      %15 = arith.truncf %14 : vector<2x2048xf32> to vector<2x2048xbf16>
      %c0_12 = arith.constant 0 : index
      %c0_13 = arith.constant 0 : index
      %16 = vector.load %arg3[%c0_12, %c0_13] : memref<2048x128xbf16, #tpu.memory_space<vmem>>, vector<2048x128xbf16>
      %cst_14 = arith.constant dense<0.000000e+00> : vector<2x128xf32>
      %17 = tpu.matmul %15, %16, %cst_14 {dimension_numbers = #tpu.dot_dimension_numbers<[1], [0], [0], [1], [0, 0, 1, 1], [], []>} : vector<2x2048xbf16>, vector<2048x128xbf16>, vector<2x128xf32> -> vector<2x128xf32>
      %c0_15 = arith.constant 0 : index
      %c0_16 = arith.constant 0 : index
      %18 = vector.load %arg4[%c0_15, %c0_16] : memref<1x128xf32, #tpu.memory_space<vmem>>, vector<1x128xf32>
      %19 = vector.broadcast %18 : vector<1x128xf32> to vector<2x128xf32>
      %20 = arith.addf %17, %19 : vector<2x128xf32>
      %c0_17 = arith.constant 0 : index
      %c0_18 = arith.constant 0 : index
      %21 = vector.load %arg5[%c0_17, %c0_18] : memref<2x128xf32, #tpu.memory_space<vmem>>, vector<2x128xf32>
      tpu.vector_store %arg5[%c0_17, %c0_18], %20 {strides = array<i32>} : memref<2x128xf32, #tpu.memory_space<vmem>>, vector<2x128xf32>,
    } else {
    }
    return
  }
  func.func @transform_0(%arg0: i32, %arg1: i32) -> (i32, i32, i32) {
    %c0_i32 = arith.constant 0 : i32
    %c0_i32_0 = arith.constant 0 : i32
    return %arg0, %arg1, %c0_i32 : i32, i32, i32
  }
  func.func @transform_1(%arg0: i32, %arg1: i32) -> (i32, i32) {
    %c0_i32 = arith.constant 0 : i32
    %c0_i32_0 = arith.constant 0 : i32
    %c0_i32_1 = arith.constant 0 : i32
    return %c0_i32, %c0_i32_0 : i32, i32
  }
  func.func @transform_2(%arg0: i32, %arg1: i32) -> (i32, i32) {
    %c0_i32 = arith.constant 0 : i32
    %c0_i32_0 = arith.constant 0 : i32
    %c0_i32_1 = arith.constant 0 : i32
    return %c0_i32, %c0_i32_0 : i32, i32
  }
  func.func @transform_3(%arg0: i32, %arg1: i32) -> (i32, i32) {
    %c0_i32 = arith.constant 0 : i32
    %c0_i32_0 = arith.constant 0 : i32
    return %arg0, %c0_i32 : i32, i32
  }
}

</mosaic_0001>

<bundles_post_ra>
// kernel: reverse
= control target key start
LH: loop header
LB: loop body
LE: loop exit
PB: predicated region body
PF: predicated region fallthrough
CT: control target
= control target key end

     0   :  { %s1534_s6 = smov 0   ;;  %s1536_s7 = smov 0   ;;  %s1914_s0 = inlined_call_operand.vmem [shape: f32[3,3,512,512], index: 0, kind: input, shape index: {}]   ;;  %s1915_s1 = inlined_call_operand.vmem [shape: bf16[3,3,512,512], index: 1, kind: output, shape index: {}]  }
   0x1   :  { %s1538_s8 = smov 0   ;;  %s1540_s9 = smov 0  }
   0x2   :  { %s1542_s10 = smov 0   ;;  %s1544_s11 = smov 0  }
   0x3   :  { %s1546_s12 = smov 0   ;;  %s1548_s13 = smov 0  }
   0x4   :  { %s1550_s14 = smov 0   ;;  %s1552_s15 = smov 0  }
   0x5   :  { %s1554_s16 = smov 0   ;;  %s1556_s17 = smov 0  }
   0x6   :  { %s1558_s18 = smov 0   ;;  %s1560_s19 = smov 0  }
   0x7   :  { %s1562_s20 = smov 0   ;;  %s1564_s21 = smov 0  }
   0x8   :  { %s1566_s22 = smov 0   ;;  %s1568_s23 = smov 0  }
   0x9   :  { %s1570_s24 = smov 0  }
   0xa LB: > { %s65_s25 = sadd.s32 1, %s1510_s21  ;;  %s69_s26 = sadd.s32 1, %s1514_s22  ;;  %s1522_s24 = sphi %s1570_s24, %s7_s24   ;;  %s1518_s23 = sphi %s1568_s23, %s1935_s23   ;;  %s1514_s22 = sphi %s1566_s22, %s1934_s22   ;;  %s1510_s21 = sphi %s1564_s21, %s1933_s21   ;;  %s1506_s20 = sphi %s1562_s20, %s1932_s20   ;;  %s1502_s19 = sphi %s1560_s19, %s1931_s19   ;;  %s1498_s18 = sphi %s1558_s18, %s1930_s18   ;;  %s1494_s17 = sphi %s1556_s17, %s1929_s17   ;;  %s1490_s16 = sphi %s1554_s16, %s1928_s16   ;;  %s1486_s15 = sphi %s1552_s15, %s1927_s15   ;;  %s1482_s14 = sphi %s1550_s14, %s1926_s14   ;;  %s1478_s13 = sphi %s1548_s13, %s1925_s13   ;;  %s1474_s12 = sphi %s1546_s12, %s1924_s12   ;;  %s1470_s11 = sphi %s1544_s11, %s1923_s11   ;;  %s1466_s10 = sphi %s1542_s10, %s1922_s10   ;;  %s1462_s9 = sphi %s1540_s9, %s1921_s9   ;;  %s1458_s8 = sphi %s1538_s8, %s1920_s8   ;;  %s1454_s7 = sphi %s1536_s7, %s1919_s7   ;;  %s1450_s6 = sphi %s1534_s6, %s1918_s6  }
   0xb   : > { %p67_p0 = scmp.ge.s32.totalorder %s65_s25, 2  ;;  %p1015_p1 = scmp.ge.s32.totalorder %s1522_s24, 5 }
   0xc   : > { %p113_p2 = scmp.lt.s32.totalorder %s1522_s24, 23  ;;  %s73_s27 = sadd.s32 1, %s1518_s23 }
   0xd   : > { %s1937_s25 = smov (%p67_p0, %s65_s25), 0  ;;  %s1939_s26 = smov (!%p67_p0, %s69_s26), %s1514_s22 }
   0xe   : > { %p114_p3 = pnand %p1015_p1, %p113_p2  ;;  %p71_p4 = scmp.ge.s32.totalorder %s1939_s26, 3 }
   0xf   : > { %s159_s28 = ssub.s32 (!%p114_p3), 2, %s1458_s8  ;;  %s160_s29 = ssub.s32 (!%p114_p3), 2, %s1454_s7 }
  0x10   : > { %s1941_s26 = smov (%p71_p4, %s1939_s26), 0  ;;  %s1943_s27 = smov (!%p71_p4, %s73_s27), %s1518_s23 }
  0x11   : > { %p75_p5 = scmp.ge.s32.totalorder %s1943_s27, 3  ;;  %117 = sbr.rel (%p114_p3) target bundleno = 97 (0x61), region = 20 }
  0x12   : > { %s1016_s30 = sshll.u32 (!%p114_p3), %s1450_s6, 5  ;;  %p163_p6 = scmp.lt.s32.totalorder (!%p114_p3), %s159_s28, 2 }
  0x13   : > { %s1945_s27 = smov (%p75_p5, %s1943_s27), 0  ;;  %p165_p7 = scmp.lt.s32.totalorder (!%p114_p3), %s160_s29, 2 }
  0x14   : > { %p167_p8 = scmp.lt.s32.totalorder (!%p114_p3), %s1016_s30, 63  ;;  %p185_p9 = scmp.lt.s32.totalorder (!%p114_p3), %s1458_s8, 2 }
  0x15   : > { %p187_p10 = scmp.lt.s32.totalorder (!%p114_p3), %s1454_s7, 2 }
  0x16   : > { %s1947_s28 = smov (!%p163_p6, %s159_s28), 2  ;;  %s1949_s29 = smov (!%p165_p7, %s160_s29), 2 }
  0x17   : > { %s1951_s30 = smov (!%p167_p8, %s1016_s30), 63  ;;  %s1018_s2 = sshll.u32 %s1949_s29, 8 }
  0x18   : > { %s1017_s3 = sshll.u32 %s1951_s30, 2  ;;  %s1218_s4 = smul.u32 768, %s1947_s28 }
  0x19   : > { %s174_s5 = sadd.s32 %s1018_s2, %s1017_s3  ;;  %s1953_s8 = smov (!%p185_p9, %s1458_s8), 2 }
  0x1a   : > { %s176_s6 = sadd.s32 %s1218_s4, %s174_s5  ;;  %s1955_s7 = smov (!%p187_p10, %s1454_s7), 2 }
  0x1b   : > { %s1019_s28 = sshll.u32 %s176_s6, 3  ;;  %s1219_s8 = smul.u32 768, %s1953_s8 }
  0x1c   : > { %s1022_s7 = sshll.u32 %s1955_s7, 8 }
  0x1d   : > { %s196_s29 = sadd.s32 %s1022_s7, %s1017_s3  ;;  %s1652_s3 = scalar_lea.vmem %s1914_s0, %s1019_s28 }
  0x1e   : > { %s198_s4 = sadd.s32 %s1219_s8, %s196_s29  ;;  %v203_v0 = vld [vmem:[%s1652_s3] sm:$0xff]  ;;  %v1055_v7 = vld [vmem:[%s1652_s3 + $0x8] sm:$0xff] }
  0x1f   : > { %s1023_s5 = sshll.u32 %s198_s4, 2  ;;  %v1024_v1 = vld [vmem:[%s1652_s3 + $0x20] sm:$0xff]  ;;  %v301_v8 = vpack.c.bf16 %v1055_v7, %v203_v0  ;;  %v1058_v9 = vld [vmem:[%s1652_s3 + $0x28] sm:$0xff] }
  0x20   : > { %v1025_v2 = vld [vmem:[%s1652_s3 + $0x40] sm:$0xff]  ;;  %s1662_s8 = scalar_lea.vmem %s1915_s1, %s1023_s5  ;;  %v1060_v10 = vld [vmem:[%s1652_s3 + $0x48] sm:$0xff]  ;;  %v307_v12 = vpack.c.bf16 %v1058_v9, %v1024_v1 }
  0x21   : > { %v1026_v3 = vld [vmem:[%s1652_s3 + $0x60] sm:$0xff]  ;;  %v1062_v11 = vld [vmem:[%s1652_s3 + $0x68] sm:$0xff]  ;;  %v313_v13 = vpack.c.bf16 %v1060_v10, %v1025_v2  ;;  %1057 = vst [vmem:[%s1662_s8] sm:$0xff] %v301_v8 }
  0x22   : > { %v1027_v4 = vld [vmem:[%s1652_s3 + $0x80] sm:$0xff]  ;;  %v319_v14 = vpack.c.bf16 %v1062_v11, %v1026_v3  ;;  %v1064_v15 = vld [vmem:[%s1652_s3 + $0x88] sm:$0xff]  ;;  %1059 = vst [vmem:[%s1662_s8 + $0x10] sm:$0xff] %v307_v12 }
  0x23   : > { %v1028_v5 = vld [vmem:[%s1652_s3 + $0xa0] sm:$0xff]  ;;  %v1066_v16 = vld [vmem:[%s1652_s3 + $0xa8] sm:$0xff]  ;;  %v325_v19 = vpack.c.bf16 %v1064_v15, %v1027_v4  ;;  %1061 = vst [vmem:[%s1662_s8 + $0x20] sm:$0xff] %v313_v13 }
  0x24   : > { %v1029_v6 = vld [vmem:[%s1652_s3 + $0xc0] sm:$0xff]  ;;  %v1068_v17 = vld [vmem:[%s1652_s3 + $0xc8] sm:$0xff]  ;;  %v331_v22 = vpack.c.bf16 %v1066_v16, %v1028_v5  ;;  %1063 = vst [vmem:[%s1662_s8 + $0x30] sm:$0xff] %v319_v14 }
  0x25   : > { %v1030_v18 = vld [vmem:[%s1652_s3 + $0xe0] sm:$0xff]  ;;  %v1070_v20 = vld [vmem:[%s1652_s3 + $0xe8] sm:$0xff]  ;;  %v337_v25 = vpack.c.bf16 %v1068_v17, %v1029_v6  ;;  %1065 = vst [vmem:[%s1662_s8 + $0x40] sm:$0xff] %v325_v19 }
  0x26   : > { %v1031_v21 = vld [vmem:[%s1652_s3 + $0x100] sm:$0xff]  ;;  %v1072_v23 = vld [vmem:[%s1652_s3 + $0x108] sm:$0xff]  ;;  %v343_v28 = vpack.c.bf16 %v1070_v20, %v1030_v18  ;;  %1067 = vst [vmem:[%s1662_s8 + $0x50] sm:$0xff] %v331_v22 }
  0x27   : > { %v1032_v24 = vld [vmem:[%s1652_s3 + $0x120] sm:$0xff]  ;;  %v1074_v26 = vld [vmem:[%s1652_s3 + $0x128] sm:$0xff]  ;;  %v349_v31 = vpack.c.bf16 %v1072_v23, %v1031_v21  ;;  %1069 = vst [vmem:[%s1662_s8 + $0x60] sm:$0xff] %v337_v25 }
  0x28   : > { %v1033_v27 = vld [vmem:[%s1652_s3 + $0x140] sm:$0xff]  ;;  %v1076_v29 = vld [vmem:[%s1652_s3 + $0x148] sm:$0xff]  ;;  %v355_v34 = vpack.c.bf16 %v1074_v26, %v1032_v24  ;;  %1071 = vst [vmem:[%s1662_s8 + $0x70] sm:$0xff] %v343_v28 }
  0x29   : > { %v1034_v30 = vld [vmem:[%s1652_s3 + $0x160] sm:$0xff]  ;;  %v1078_v32 = vld [vmem:[%s1652_s3 + $0x168] sm:$0xff]  ;;  %v361_v37 = vpack.c.bf16 %v1076_v29, %v1033_v27  ;;  %1073 = vst [vmem:[%s1662_s8 + $0x80] sm:$0xff] %v349_v31  ;;  %v1152_v31 = vld [vmem:[%s1652_s3 + $0x18] sm:$0xff] }
  0x2a   : > { %v1035_v33 = vld [vmem:[%s1652_s3 + $0x180] sm:$0xff]  ;;  %v1080_v35 = vld [vmem:[%s1652_s3 + $0x188] sm:$0xff]  ;;  %v367_v40 = vpack.c.bf16 %v1078_v32, %v1034_v30  ;;  %1075 = vst [vmem:[%s1662_s8 + $0x90] sm:$0xff] %v355_v34  ;;  %v1120_v30 = vld [vmem:[%s1652_s3 + $0x10] sm:$0xff] }
  0x2b   : > { %v1036_v36 = vld [vmem:[%s1652_s3 + $0x1a0] sm:$0xff]  ;;  %v1082_v38 = vld [vmem:[%s1652_s3 + $0x1a8] sm:$0xff]  ;;  %v373_v43 = vpack.c.bf16 %v1080_v35, %v1035_v33  ;;  %1077 = vst [vmem:[%s1662_s8 + $0xa0] sm:$0xff] %v361_v37  ;;  %v1121_v33 = vld [vmem:[%s1652_s3 + $0x30] sm:$0xff] }
  0x2c   : > { %v1037_v39 = vld [vmem:[%s1652_s3 + $0x1c0] sm:$0xff]  ;;  %v1084_v41 = vld [vmem:[%s1652_s3 + $0x1c8] sm:$0xff]  ;;  %v379_v46 = vpack.c.bf16 %v1082_v38, %v1036_v36  ;;  %1079 = vst [vmem:[%s1662_s8 + $0xb0] sm:$0xff] %v367_v40  ;;  %v1154_v34 = vld [vmem:[%s1652_s3 + $0x38] sm:$0xff] }
  0x2d   : > { %v1038_v42 = vld [vmem:[%s1652_s3 + $0x1e0] sm:$0xff]  ;;  %v1086_v44 = vld [vmem:[%s1652_s3 + $0x1e8] sm:$0xff]  ;;  %v385_v49 = vpack.c.bf16 %v1084_v41, %v1037_v39  ;;  %1081 = vst [vmem:[%s1662_s8 + $0xc0] sm:$0xff] %v373_v43  ;;  %v1122_v36 = vld [vmem:[%s1652_s3 + $0x50] sm:$0xff]  ;;  %v589_v39 = vpack.c.bf16 %v1152_v31, %v1120_v30 }
  0x2e   : > { %v1039_v45 = vld [vmem:[%s1652_s3 + $0x200] sm:$0xff]  ;;  %v1088_v47 = vld [vmem:[%s1652_s3 + $0x208] sm:$0xff]  ;;  %v391_v52 = vpack.c.bf16 %v1086_v44, %v1038_v42  ;;  %1083 = vst [vmem:[%s1662_s8 + $0xd0] sm:$0xff] %v379_v46  ;;  %v1156_v37 = vld [vmem:[%s1652_s3 + $0x58] sm:$0xff]  ;;  %v595_v42 = vpack.c.bf16 %v1154_v34, %v1121_v33 }
  0x2f   : > { %v1040_v48 = vld [vmem:[%s1652_s3 + $0x220] sm:$0xff]  ;;  %v1090_v50 = vld [vmem:[%s1652_s3 + $0x228] sm:$0xff]  ;;  %v397_v55 = vpack.c.bf16 %v1088_v47, %v1039_v45  ;;  %1085 = vst [vmem:[%s1662_s8 + $0xe0] sm:$0xff] %v385_v49  ;;  %v1123_v38 = vld [vmem:[%s1652_s3 + $0x70] sm:$0xff]  ;;  %v601_v45 = vpack.c.bf16 %v1156_v37, %v1122_v36 }
  0x30   : > { %v1041_v51 = vld [vmem:[%s1652_s3 + $0x240] sm:$0xff]  ;;  %v1092_v53 = vld [vmem:[%s1652_s3 + $0x248] sm:$0xff]  ;;  %v403_v58 = vpack.c.bf16 %v1090_v50, %v1040_v48  ;;  %1087 = vst [vmem:[%s1662_s8 + $0xf0] sm:$0xff] %v391_v52  ;;  %v1158_v40 = vld [vmem:[%s1652_s3 + $0x78] sm:$0xff] }
  0x31   : > { %v1042_v54 = vld [vmem:[%s1652_s3 + $0x260] sm:$0xff]  ;;  %v1094_v56 = vld [vmem:[%s1652_s3 + $0x268] sm:$0xff]  ;;  %v409_v61 = vpack.c.bf16 %v1092_v53, %v1041_v51  ;;  %1089 = vst [vmem:[%s1662_s8 + $0x100] sm:$0xff] %v397_v55  ;;  %v1124_v41 = vld [vmem:[%s1652_s3 + $0x90] sm:$0xff]  ;;  %v607_v48 = vpack.c.bf16 %v1158_v40, %v1123_v38 }
  0x32   : > { %v1043_v57 = vld [vmem:[%s1652_s3 + $0x280] sm:$0xff]  ;;  %v1096_v59 = vld [vmem:[%s1652_s3 + $0x288] sm:$0xff]  ;;  %v415_v0 = vpack.c.bf16 %v1094_v56, %v1042_v54  ;;  %1091 = vst [vmem:[%s1662_s8 + $0x110] sm:$0xff] %v403_v58  ;;  %v1160_v43 = vld [vmem:[%s1652_s3 + $0x98] sm:$0xff] }
  0x33   : > { %v1044_v60 = vld [vmem:[%s1652_s3 + $0x2a0] sm:$0xff]  ;;  %v1098_v62 = vld [vmem:[%s1652_s3 + $0x2a8] sm:$0xff]  ;;  %v421_v3 = vpack.c.bf16 %v1096_v59, %v1043_v57  ;;  %1093 = vst [vmem:[%s1662_s8 + $0x120] sm:$0xff] %v409_v61  ;;  %v1125_v44 = vld [vmem:[%s1652_s3 + $0xb0] sm:$0xff]  ;;  %v613_v51 = vpack.c.bf16 %v1160_v43, %v1124_v41 }
  0x34   : > { %v1045_v63 = vld [vmem:[%s1652_s3 + $0x2c0] sm:$0xff]  ;;  %v1100_v1 = vld [vmem:[%s1652_s3 + $0x2c8] sm:$0xff]  ;;  %v427_v6 = vpack.c.bf16 %v1098_v62, %v1044_v60  ;;  %1095 = vst [vmem:[%s1662_s8 + $0x130] sm:$0xff] %v415_v0  ;;  %v1162_v46 = vld [vmem:[%s1652_s3 + $0xb8] sm:$0xff] }
  0x35   : > { %v1046_v2 = vld [vmem:[%s1652_s3 + $0x2e0] sm:$0xff]  ;;  %v1102_v4 = vld [vmem:[%s1652_s3 + $0x2e8] sm:$0xff]  ;;  %v433_v9 = vpack.c.bf16 %v1100_v1, %v1045_v63  ;;  %1097 = vst [vmem:[%s1662_s8 + $0x140] sm:$0xff] %v421_v3  ;;  %v1126_v47 = vld [vmem:[%s1652_s3 + $0xd0] sm:$0xff]  ;;  %v619_v54 = vpack.c.bf16 %v1162_v46, %v1125_v44 }
  0x36   : > { %v1047_v5 = vld [vmem:[%s1652_s3 + $0x300] sm:$0xff]  ;;  %v1104_v7 = vld [vmem:[%s1652_s3 + $0x308] sm:$0xff]  ;;  %v439_v12 = vpack.c.bf16 %v1102_v4, %v1046_v2  ;;  %1099 = vst [vmem:[%s1662_s8 + $0x150] sm:$0xff] %v427_v6  ;;  %v1164_v49 = vld [vmem:[%s1652_s3 + $0xd8] sm:$0xff] }
  0x37   : > { %v1048_v8 = vld [vmem:[%s1652_s3 + $0x320] sm:$0xff]  ;;  %v1106_v10 = vld [vmem:[%s1652_s3 + $0x328] sm:$0xff]  ;;  %v445_v15 = vpack.c.bf16 %v1104_v7, %v1047_v5  ;;  %1101 = vst [vmem:[%s1662_s8 + $0x160] sm:$0xff] %v433_v9  ;;  %v1127_v50 = vld [vmem:[%s1652_s3 + $0xf0] sm:$0xff]  ;;  %v625_v57 = vpack.c.bf16 %v1164_v49, %v1126_v47 }
  0x38   : > { %v1049_v11 = vld [vmem:[%s1652_s3 + $0x340] sm:$0xff]  ;;  %v1108_v13 = vld [vmem:[%s1652_s3 + $0x348] sm:$0xff]  ;;  %v451_v18 = vpack.c.bf16 %v1106_v10, %v1048_v8  ;;  %1103 = vst [vmem:[%s1662_s8 + $0x170] sm:$0xff] %v439_v12  ;;  %v1166_v52 = vld [vmem:[%s1652_s3 + $0xf8] sm:$0xff] }
  0x39   : > { %v1050_v14 = vld [vmem:[%s1652_s3 + $0x360] sm:$0xff]  ;;  %v1110_v16 = vld [vmem:[%s1652_s3 + $0x368] sm:$0xff]  ;;  %v457_v21 = vpack.c.bf16 %v1108_v13, %v1049_v11  ;;  %1105 = vst [vmem:[%s1662_s8 + $0x180] sm:$0xff] %v445_v15  ;;  %v1128_v53 = vld [vmem:[%s1652_s3 + $0x110] sm:$0xff]  ;;  %v631_v60 = vpack.c.bf16 %v1166_v52, %v1127_v50 }
  0x3a   : > { %v1051_v17 = vld [vmem:[%s1652_s3 + $0x380] sm:$0xff]  ;;  %v1112_v19 = vld [vmem:[%s1652_s3 + $0x388] sm:$0xff]  ;;  %v463_v24 = vpack.c.bf16 %v1110_v16, %v1050_v14  ;;  %1107 = vst [vmem:[%s1662_s8 + $0x190] sm:$0xff] %v451_v18  ;;  %v1168_v55 = vld [vmem:[%s1652_s3 + $0x118] sm:$0xff] }
  0x3b   : > { %v1052_v20 = vld [vmem:[%s1652_s3 + $0x3a0] sm:$0xff]  ;;  %v1114_v22 = vld [vmem:[%s1652_s3 + $0x3a8] sm:$0xff]  ;;  %v469_v27 = vpack.c.bf16 %v1112_v19, %v1051_v17  ;;  %1109 = vst [vmem:[%s1662_s8 + $0x1a0] sm:$0xff] %v457_v21  ;;  %v1129_v56 = vld [vmem:[%s1652_s3 + $0x130] sm:$0xff]  ;;  %v637_v63 = vpack.c.bf16 %v1168_v55, %v1128_v53 }
  0x3c   : > { %v1053_v23 = vld [vmem:[%s1652_s3 + $0x3c0] sm:$0xff]  ;;  %v1116_v25 = vld [vmem:[%s1652_s3 + $0x3c8] sm:$0xff]  ;;  %v475_v29 = vpack.c.bf16 %v1114_v22, %v1052_v20  ;;  %1111 = vst [vmem:[%s1662_s8 + $0x1b0] sm:$0xff] %v463_v24  ;;  %v1170_v58 = vld [vmem:[%s1652_s3 + $0x138] sm:$0xff] }
  0x3d   : > { %v1054_v26 = vld [vmem:[%s1652_s3 + $0x3e0] sm:$0xff]  ;;  %v1118_v28 = vld [vmem:[%s1652_s3 + $0x3e8] sm:$0xff]  ;;  %v481_v32 = vpack.c.bf16 %v1116_v25, %v1053_v23  ;;  %1113 = vst [vmem:[%s1662_s8 + $0x1c0] sm:$0xff] %v469_v27  ;;  %v1130_v59 = vld [vmem:[%s1652_s3 + $0x150] sm:$0xff]  ;;  %v643_v2 = vpack.c.bf16 %v1170_v58, %v1129_v56 }
  0x3e   : > { %v487_v35 = vpack.c.bf16 %v1118_v28, %v1054_v26  ;;  %1115 = vst [vmem:[%s1662_s8 + $0x1d0] sm:$0xff] %v475_v29  ;;  %v1172_v61 = vld [vmem:[%s1652_s3 + $0x158] sm:$0xff]  ;;  %v1131_v62 = vld [vmem:[%s1652_s3 + $0x170] sm:$0xff] }
  0x3f   : > { %1117 = vst [vmem:[%s1662_s8 + $0x1e0] sm:$0xff] %v481_v32  ;;  %v1174_v0 = vld [vmem:[%s1652_s3 + $0x178] sm:$0xff]  ;;  %v1132_v1 = vld [vmem:[%s1652_s3 + $0x190] sm:$0xff]  ;;  %v649_v5 = vpack.c.bf16 %v1172_v61, %v1130_v59 }
  0x40   : > { %1119 = vst [vmem:[%s1662_s8 + $0x1f0] sm:$0xff] %v487_v35  ;;  %v1176_v3 = vld [vmem:[%s1652_s3 + $0x198] sm:$0xff]  ;;  %v1133_v4 = vld [vmem:[%s1652_s3 + $0x1b0] sm:$0xff]  ;;  %v655_v8 = vpack.c.bf16 %v1174_v0, %v1131_v62 }
  0x41   : > { %1153 = vst [vmem:[%s1662_s8 + $0x8] sm:$0xff] %v589_v39  ;;  %v1178_v6 = vld [vmem:[%s1652_s3 + $0x1b8] sm:$0xff]  ;;  %v1134_v7 = vld [vmem:[%s1652_s3 + $0x1d0] sm:$0xff]  ;;  %v661_v11 = vpack.c.bf16 %v1176_v3, %v1132_v1 }
  0x42   : > { %1155 = vst [vmem:[%s1662_s8 + $0x18] sm:$0xff] %v595_v42  ;;  %v1180_v9 = vld [vmem:[%s1652_s3 + $0x1d8] sm:$0xff]  ;;  %v1135_v10 = vld [vmem:[%s1652_s3 + $0x1f0] sm:$0xff]  ;;  %v667_v14 = vpack.c.bf16 %v1178_v6, %v1133_v4 }
  0x43   : > { %1157 = vst [vmem:[%s1662_s8 + $0x28] sm:$0xff] %v601_v45  ;;  %v1182_v12 = vld [vmem:[%s1652_s3 + $0x1f8] sm:$0xff]  ;;  %v1136_v13 = vld [vmem:[%s1652_s3 + $0x210] sm:$0xff]  ;;  %v673_v17 = vpack.c.bf16 %v1180_v9, %v1134_v7 }
  0x44   : > { %1159 = vst [vmem:[%s1662_s8 + $0x38] sm:$0xff] %v607_v48  ;;  %v1184_v15 = vld [vmem:[%s1652_s3 + $0x218] sm:$0xff]  ;;  %v1137_v16 = vld [vmem:[%s1652_s3 + $0x230] sm:$0xff]  ;;  %v679_v20 = vpack.c.bf16 %v1182_v12, %v1135_v10 }
  0x45   : > { %1161 = vst [vmem:[%s1662_s8 + $0x48] sm:$0xff] %v613_v51  ;;  %v1186_v18 = vld [vmem:[%s1652_s3 + $0x238] sm:$0xff]  ;;  %v1138_v19 = vld [vmem:[%s1652_s3 + $0x250] sm:$0xff]  ;;  %v685_v23 = vpack.c.bf16 %v1184_v15, %v1136_v13 }
  0x46   : > { %1163 = vst [vmem:[%s1662_s8 + $0x58] sm:$0xff] %v619_v54  ;;  %v1188_v21 = vld [vmem:[%s1652_s3 + $0x258] sm:$0xff]  ;;  %v1139_v22 = vld [vmem:[%s1652_s3 + $0x270] sm:$0xff]  ;;  %v691_v26 = vpack.c.bf16 %v1186_v18, %v1137_v16 }
  0x47   : > { %1165 = vst [vmem:[%s1662_s8 + $0x68] sm:$0xff] %v625_v57  ;;  %v1190_v24 = vld [vmem:[%s1652_s3 + $0x278] sm:$0xff]  ;;  %v1140_v25 = vld [vmem:[%s1652_s3 + $0x290] sm:$0xff]  ;;  %v697_v29 = vpack.c.bf16 %v1188_v21, %v1138_v19 }
  0x48   : > { %1167 = vst [vmem:[%s1662_s8 + $0x78] sm:$0xff] %v631_v60  ;;  %v1192_v27 = vld [vmem:[%s1652_s3 + $0x298] sm:$0xff]  ;;  %v1141_v28 = vld [vmem:[%s1652_s3 + $0x2b0] sm:$0xff]  ;;  %v703_v32 = vpack.c.bf16 %v1190_v24, %v1139_v22 }
  0x49   : > { %1169 = vst [vmem:[%s1662_s8 + $0x88] sm:$0xff] %v637_v63  ;;  %v1194_v30 = vld [vmem:[%s1652_s3 + $0x2b8] sm:$0xff]  ;;  %v1142_v31 = vld [vmem:[%s1652_s3 + $0x2d0] sm:$0xff]  ;;  %v709_v35 = vpack.c.bf16 %v1192_v27, %v1140_v25 }
  0x4a   : > { %1171 = vst [vmem:[%s1662_s8 + $0x98] sm:$0xff] %v643_v2  ;;  %v1196_v33 = vld [vmem:[%s1652_s3 + $0x2d8] sm:$0xff]  ;;  %v1143_v34 = vld [vmem:[%s1652_s3 + $0x2f0] sm:$0xff]  ;;  %v715_v38 = vpack.c.bf16 %v1194_v30, %v1141_v28 }
  0x4b   : > { %1173 = vst [vmem:[%s1662_s8 + $0xa8] sm:$0xff] %v649_v5  ;;  %v1198_v36 = vld [vmem:[%s1652_s3 + $0x2f8] sm:$0xff]  ;;  %v1144_v37 = vld [vmem:[%s1652_s3 + $0x310] sm:$0xff]  ;;  %v721_v41 = vpack.c.bf16 %v1196_v33, %v1142_v31 }
  0x4c   : > { %1175 = vst [vmem:[%s1662_s8 + $0xb8] sm:$0xff] %v655_v8  ;;  %v1200_v39 = vld [vmem:[%s1652_s3 + $0x318] sm:$0xff]  ;;  %v1145_v40 = vld [vmem:[%s1652_s3 + $0x330] sm:$0xff]  ;;  %v727_v44 = vpack.c.bf16 %v1198_v36, %v1143_v34 }
  0x4d   : > { %1177 = vst [vmem:[%s1662_s8 + $0xc8] sm:$0xff] %v661_v11  ;;  %v1202_v42 = vld [vmem:[%s1652_s3 + $0x338] sm:$0xff]  ;;  %v1146_v43 = vld [vmem:[%s1652_s3 + $0x350] sm:$0xff]  ;;  %v733_v47 = vpack.c.bf16 %v1200_v39, %v1144_v37 }
  0x4e   : > { %1179 = vst [vmem:[%s1662_s8 + $0xd8] sm:$0xff] %v667_v14  ;;  %v1204_v45 = vld [vmem:[%s1652_s3 + $0x358] sm:$0xff]  ;;  %v1147_v46 = vld [vmem:[%s1652_s3 + $0x370] sm:$0xff]  ;;  %v739_v50 = vpack.c.bf16 %v1202_v42, %v1145_v40 }
  0x4f   : > { %1181 = vst [vmem:[%s1662_s8 + $0xe8] sm:$0xff] %v673_v17  ;;  %v1206_v48 = vld [vmem:[%s1652_s3 + $0x378] sm:$0xff]  ;;  %v1148_v49 = vld [vmem:[%s1652_s3 + $0x390] sm:$0xff]  ;;  %v745_v53 = vpack.c.bf16 %v1204_v45, %v1146_v43 }
  0x50   : > { %1183 = vst [vmem:[%s1662_s8 + $0xf8] sm:$0xff] %v679_v20  ;;  %v1208_v51 = vld [vmem:[%s1652_s3 + $0x398] sm:$0xff]  ;;  %v1149_v52 = vld [vmem:[%s1652_s3 + $0x3b0] sm:$0xff]  ;;  %v751_v56 = vpack.c.bf16 %v1206_v48, %v1147_v46 }
  0x51   : > { %1185 = vst [vmem:[%s1662_s8 + $0x108] sm:$0xff] %v685_v23  ;;  %v1210_v54 = vld [vmem:[%s1652_s3 + $0x3b8] sm:$0xff]  ;;  %v1150_v55 = vld [vmem:[%s1652_s3 + $0x3d0] sm:$0xff]  ;;  %v757_v59 = vpack.c.bf16 %v1208_v51, %v1148_v49 }
  0x52   : > { %1187 = vst [vmem:[%s1662_s8 + $0x118] sm:$0xff] %v691_v26  ;;  %v1212_v57 = vld [vmem:[%s1652_s3 + $0x3d8] sm:$0xff]  ;;  %v1151_v58 = vld [vmem:[%s1652_s3 + $0x3f0] sm:$0xff]  ;;  %v763_v61 = vpack.c.bf16 %v1210_v54, %v1149_v52 }
  0x53   : > { %1189 = vst [vmem:[%s1662_s8 + $0x128] sm:$0xff] %v697_v29  ;;  %v1214_v60 = vld [vmem:[%s1652_s3 + $0x3f8] sm:$0xff]  ;;  %v769_v62 = vpack.c.bf16 %v1212_v57, %v1150_v55 }
  0x54   : > { %1191 = vst [vmem:[%s1662_s8 + $0x138] sm:$0xff] %v703_v32  ;;  %v775_v63 = vpack.c.bf16 %v1214_v60, %v1151_v58 }
  0x55   : > { %1193 = vst [vmem:[%s1662_s8 + $0x148] sm:$0xff] %v709_v35 }
  0x56   : > { %1195 = vst [vmem:[%s1662_s8 + $0x158] sm:$0xff] %v715_v38 }
  0x57   : > { %1197 = vst [vmem:[%s1662_s8 + $0x168] sm:$0xff] %v721_v41 }
  0x58   : > { %1199 = vst [vmem:[%s1662_s8 + $0x178] sm:$0xff] %v727_v44 }
  0x59   : > { %1201 = vst [vmem:[%s1662_s8 + $0x188] sm:$0xff] %v733_v47 }
  0x5a   : > { %1203 = vst [vmem:[%s1662_s8 + $0x198] sm:$0xff] %v739_v50 }
  0x5b   : > { %1205 = vst [vmem:[%s1662_s8 + $0x1a8] sm:$0xff] %v745_v53 }
  0x5c   : > { %1207 = vst [vmem:[%s1662_s8 + $0x1b8] sm:$0xff] %v751_v56 }
  0x5d   : > { %1209 = vst [vmem:[%s1662_s8 + $0x1c8] sm:$0xff] %v757_v59 }
  0x5e   : > { %1211 = vst [vmem:[%s1662_s8 + $0x1d8] sm:$0xff] %v763_v61 }
  0x5f   : > { %1213 = vst [vmem:[%s1662_s8 + $0x1e8] sm:$0xff] %v769_v62 }
  0x60   : > { %1215 = vst [vmem:[%s1662_s8 + $0x1f8] sm:$0xff] %v775_v63 }
  0x61 PF: > { %s7_s24 = sadd.s32 1, %s1522_s24   ;;  %s1918_s6 = smov %s1462_s9 }
  0x62   : > { %p1852_p11 = scmp.ge.s32.totalorder %s7_s24, 28   ;;  %s1919_s7 = smov %s1466_s10 }
  0x63   : > { %s1920_s8 = smov %s1470_s11  ;;  %s1921_s9 = smov %s1474_s12 }
  0x64   : > { %s1922_s10 = smov %s1478_s13  ;;  %s1923_s11 = smov %s1482_s14 }
  0x65   : > { %s1924_s12 = smov %s1486_s15  ;;  %s1925_s13 = smov %s1490_s16 }
  0x66   : > { %s1926_s14 = smov %s1494_s17  ;;  %s1927_s15 = smov %s1498_s18 }
  0x67   : > { %s1928_s16 = smov %s1502_s19  ;;  %s1929_s17 = smov %s1506_s20 }
  0x68   : > { %s1930_s18 = smov %s1510_s21  ;;  %s1931_s19 = smov %s1514_s22 }
  0x69   : > { %s1932_s20 = smov %s1518_s23  ;;  %s1933_s21 = smov %s1937_s25 }
  0x6a   : > { %s1934_s22 = smov %s1941_s26  ;;  %s1935_s23 = smov %s1945_s27 }
  0x6b   :  { %6 = sbr.rel (!%p1852_p11) target bundleno = 10 (0xa), region = 359 }

// kernel: bsn_forward.1
= control target key start
LH: loop header
LB: loop body
LE: loop exit
PB: predicated region body
PF: predicated region fallthrough
CT: control target
= control target key end

     0   :  { %vm149_vm0 = vcmask 1043456   ;;  %vm430_vm1 = vcmask 1041408   ;;  %vm432_vm2 = vcmask 1045508   ;;  %vm461_vm3 = vcmask 1041409   ;;  %s3037_s1 = inlined_call_operand.vmem [shape: bf16[2048,128], index: 1, kind: input, shape index: {}]   ;;  %s3038_s0 = inlined_call_operand.vmem [shape: bf16[2,4,2048], index: 0, kind: input, shape index: {}]   ;;  %s3039_s2 = inlined_call_operand.vmem [shape: f32[1,128], index: 2, kind: input, shape index: {}]   ;;  %s3040_s3 = inlined_call_operand.vmem [shape: f32[2,128], index: 3, kind: output, shape index: {}]  }
   0x1   :  { %v2330_v0 = vld [vmem:[%s3037_s1 + $0x38] sm:$0xff]  ;;  %v2329_v4 = vld [vmem:[%s3037_s1 + $0x30] sm:$0xff]  ;;  %v2328_v8 = vld [vmem:[%s3037_s1 + $0x28] sm:$0xff]  ;;  %vm463_vm4 = vcmask 1043459   ;;  %vm465_vm5 = vcmask 1045509   ;;  %vm467_vm6 = vcmask 1047559  }
   0x2   :  { %v2338_v1 = vld [vmem:[%s3037_s1 + $0x78] sm:$0xff]  ;;  %1598 = vmatpush.bf16.msra.mxu0 %v2330_v0  ;;  %v2337_v5 = vld [vmem:[%s3037_s1 + $0x70] sm:$0xff]  ;;  %v2336_v9 = vld [vmem:[%s3037_s1 + $0x68] sm:$0xff] }
   0x3   :  { %v2346_v2 = vld [vmem:[%s3037_s1 + $0xb8] sm:$0xff]  ;;  %1611 = vmatpush.bf16.msra.mxu1 %v2338_v1  ;;  %v2345_v6 = vld [vmem:[%s3037_s1 + $0xb0] sm:$0xff]  ;;  %v2344_v10 = vld [vmem:[%s3037_s1 + $0xa8] sm:$0xff] }
   0x4   :  { %v2354_v3 = vld [vmem:[%s3037_s1 + $0xf8] sm:$0xff]  ;;  %1624 = vmatpush.bf16.msra.mxu2 %v2346_v2  ;;  %v2353_v7 = vld [vmem:[%s3037_s1 + $0xf0] sm:$0xff]  ;;  %v2352_v11 = vld [vmem:[%s3037_s1 + $0xe8] sm:$0xff] }
   0x5   :  { %1637 = vmatpush.bf16.msra.mxu3 %v2354_v3  ;;  %v2327_v12 = vld [vmem:[%s3037_s1 + $0x20] sm:$0xff]  ;;  %v2326_v16 = vld [vmem:[%s3037_s1 + $0x18] sm:$0xff]  ;;  %v2325_v21 = vld [vmem:[%s3037_s1 + $0x10] sm:$0xff] }
   0x6   :  { %1599 = vmatpush.bf16.msra.mxu0 %v2329_v4  ;;  %v2335_v13 = vld [vmem:[%s3037_s1 + $0x60] sm:$0xff]  ;;  %v2334_v17 = vld [vmem:[%s3037_s1 + $0x58] sm:$0xff]  ;;  %v2333_v22 = vld [vmem:[%s3037_s1 + $0x50] sm:$0xff] }
   0x7   :  { %1612 = vmatpush.bf16.msra.mxu1 %v2337_v5  ;;  %v2343_v14 = vld [vmem:[%s3037_s1 + $0xa0] sm:$0xff]  ;;  %v2342_v18 = vld [vmem:[%s3037_s1 + $0x98] sm:$0xff]  ;;  %v27_v25 = vld [vmem:[%s3038_s0 + $0x8] sm:$0xff] }
   0x8   :  { %1625 = vmatpush.bf16.msra.mxu2 %v2345_v6  ;;  %v2351_v15 = vld [vmem:[%s3037_s1 + $0xe0] sm:$0xff]  ;;  %v2350_v19 = vld [vmem:[%s3037_s1 + $0xd8] sm:$0xff]  ;;  %v2341_v26 = vld [vmem:[%s3037_s1 + $0x90] sm:$0xff]  ;;  %v36_v28 = vunpack.c.l.bf16 %v27_v25  ;;  %v37_v29 = vunpack.c.h.bf16 %v27_v25 }
   0x9   :  { %1638 = vmatpush.bf16.msra.mxu3 %v2353_v7  ;;  %v26_v20 = vld [vmem:[%s3038_s0] sm:$0xff]  ;;  %v2349_v27 = vld [vmem:[%s3037_s1 + $0xd0] sm:$0xff]  ;;  %v2324_v30 = vld [vmem:[%s3037_s1 + $0x8] sm:$0xff] }
   0xa   :  { %1600 = vmatpush.bf16.msra.mxu0 %v2328_v8  ;;  %v34_v23 = vunpack.c.l.bf16 %v26_v20  ;;  %v35_v24 = vunpack.c.h.bf16 %v26_v20  ;;  %v2332_v31 = vld [vmem:[%s3037_s1 + $0x48] sm:$0xff]  ;;  %70 = vst [vmem:[#allocation1 + $0x20] ss:$2 sm:$0xff] %v36_v28  ;;  %v28_v34 = vld [vmem:[%s3038_s0 + $0x10] sm:$0xff]  ;;  %v2323_v35 = vld [vmem:[%s3037_s1] sm:$0xff] }
   0xb   :  { %1613 = vmatpush.bf16.msra.mxu1 %v2336_v9  ;;  %v2340_v32 = vld [vmem:[%s3037_s1 + $0x88] sm:$0xff]  ;;  %72 = vst [vmem:[#allocation1 + $0x30] ss:$2 sm:$0xff] %v37_v29  ;;  %v2331_v36 = vld [vmem:[%s3037_s1 + $0x40] sm:$0xff]  ;;  %v2362_v39 = vld [vmem:[%s3037_s1 + $0x138] sm:$0xff]  ;;  %v38_v40 = vunpack.c.l.bf16 %v28_v34  ;;  %v39_v45 = vunpack.c.h.bf16 %v28_v34 }
   0xc   :  { %1626 = vmatpush.bf16.msra.mxu2 %v2344_v10  ;;  %66 = vst [vmem:[#allocation1] ss:$2 sm:$0xff] %v34_v23  ;;  %v2348_v33 = vld [vmem:[%s3037_s1 + $0xc8] sm:$0xff]  ;;  %v2339_v37 = vld [vmem:[%s3037_s1 + $0x80] sm:$0xff]  ;;  %v29_v41 = vld [vmem:[%s3038_s0 + $0x18] sm:$0xff] }
   0xd   :  { %1639 = vmatpush.bf16.msra.mxu3 %v2352_v11  ;;  %68 = vst [vmem:[#allocation1 + $0x10] ss:$2 sm:$0xff] %v35_v24  ;;  %v2347_v38 = vld [vmem:[%s3037_s1 + $0xc0] sm:$0xff]  ;;  %v2370_v42 = vld [vmem:[%s3037_s1 + $0x178] sm:$0xff]  ;;  %v40_v50 = vunpack.c.l.bf16 %v29_v41  ;;  %v2361_v51 = vld [vmem:[%s3037_s1 + $0x130] sm:$0xff]  ;;  %v41_v0 = vunpack.c.h.bf16 %v29_v41 }
   0xe   :  { %1601 = vmatpush.bf16.msra.mxu0 %v2327_v12  ;;  %v2378_v43 = vld [vmem:[%s3037_s1 + $0x1b8] sm:$0xff]  ;;  %v2369_v52 = vld [vmem:[%s3037_s1 + $0x170] sm:$0xff]  ;;  %v30_v63 = vld [vmem:[%s3038_s0 + $0x20] sm:$0xff] }
   0xf   :  { %1614 = vmatpush.bf16.msra.mxu1 %v2335_v13  ;;  %v2386_v44 = vld [vmem:[%s3037_s1 + $0x1f8] sm:$0xff]  ;;  %v2377_v57 = vld [vmem:[%s3037_s1 + $0x1b0] sm:$0xff]  ;;  %v2360_v7 = vld [vmem:[%s3037_s1 + $0x128] sm:$0xff]  ;;  %v42_v13 = vunpack.c.l.bf16 %v30_v63 }
  0x10   :  { %1627 = vmatpush.bf16.msra.mxu2 %v2343_v14  ;;  %v2385_v62 = vld [vmem:[%s3037_s1 + $0x1f0] sm:$0xff]  ;;  %v2368_v8 = vld [vmem:[%s3037_s1 + $0x168] sm:$0xff]  ;;  %v2359_v25 = vld [vmem:[%s3037_s1 + $0x120] sm:$0xff] }
  0x11   :  { %1640 = vmatpush.bf16.msra.mxu3 %v2351_v15  ;;  %v2611_v1 = vld.sshfl [vmem:[#allocation1 + $0x20] sm:$0xff pattern:$0x75316420]  ;;  %v2613_v5 = vld.sshfl [vmem:[#allocation1 + $0x28] sm:$0xff pattern:$0x75316420] }
  0x12   :  { %1602 = vmatpush.bf16.msra.mxu0 %v2326_v16  ;;  %v2615_v6 = vld.sshfl [vmem:[#allocation1 + $0x30] sm:$0xff pattern:$0x75316420]  ;;  %v2623_v10 = vld.sshfl [vmem:[#allocation1 + $0x38] sm:$0xff pattern:$0x75316420] }
  0x13   :  { %1615 = vmatpush.bf16.msra.mxu1 %v2334_v17  ;;  %v73_v46 = vld.sshfl [vmem:[#allocation1] sm:$0xff pattern:$0x75316420]  ;;  %v74_v47 = vld.sshfl [vmem:[#allocation1 + $0x8] sm:$0xff pattern:$0x75316420] }
  0x14   :  { %1628 = vmatpush.bf16.msra.mxu2 %v2342_v18  ;;  %v75_v48 = vld.sshfl [vmem:[#allocation1 + $0x10] sm:$0xff pattern:$0x75316420]  ;;  %v76_v49 = vld.sshfl [vmem:[#allocation1 + $0x18] sm:$0xff pattern:$0x75316420]  ;;  %v43_v18 = vunpack.c.h.bf16 %v30_v63 }
  0x15   :  { %1641 = vmatpush.bf16.msra.mxu3 %v2350_v19  ;;  %81 = vst [vmem:[#allocation1] ss:$2 sm:$0xff] %v38_v40  ;;  %v150_v53 = vsel %vm149_vm0, %v73_v46, 0.0  ;;  %v157_v54 = vsel %vm149_vm0, %v74_v47, 0.0  ;;  %v164_v55 = vsel %vm149_vm0, %v75_v48, 0.0  ;;  %v171_v56 = vsel %vm149_vm0, %v76_v49, 0.0 }
  0x16   :  { %1603 = vmatpush.bf16.msra.mxu0 %v2325_v21  ;;  %82 = vst [vmem:[#allocation1 + $0x10] ss:$2 sm:$0xff] %v39_v45  ;;  %v151_v58 = vrot.slane %v150_v53, 4  ;;  %v158_v59 = vrot.slane %v157_v54, 4  ;;  %v165_v60 = vrot.slane %v164_v55, 4  ;;  %v172_v61 = vrot.slane %v171_v56, 4 }
  0x17   :  { %1616 = vmatpush.bf16.msra.mxu1 %v2333_v22  ;;  %v2376_v11 = vld [vmem:[%s3037_s1 + $0x1a8] sm:$0xff]  ;;  %v2631_v12 = vld [vmem:[%s3038_s0 + $0x30] sm:$0xff]  ;;  %83 = vst [vmem:[#allocation1 + $0x20] ss:$2 sm:$0xff] %v40_v50  ;;  %v2383_v40 = vld [vmem:[%s3037_s1 + $0x1e0] sm:$0xff] }
  0x18   :  { %1629 = vmatpush.bf16.msra.mxu2 %v2341_v26  ;;  %v152_v2 = vadd.f32 %v151_v58, %v150_v53  ;;  %v159_v3 = vadd.f32 %v158_v59, %v157_v54  ;;  %v166_v4 = vadd.f32 %v165_v60, %v164_v55  ;;  %v173_v9 = vadd.f32 %v172_v61, %v171_v56  ;;  %v2384_v17 = vld [vmem:[%s3037_s1 + $0x1e8] sm:$0xff]  ;;  %v2367_v26 = vld [vmem:[%s3037_s1 + $0x160] sm:$0xff]  ;;  %v2358_v49 = vld [vmem:[%s3037_s1 + $0x118] sm:$0xff] }
  0x19   :  { %1642 = vmatpush.bf16.msra.mxu3 %v2349_v27  ;;  %84 = vst [vmem:[#allocation1 + $0x30] ss:$2 sm:$0xff] %v41_v0  ;;  %v46_v27 = vunpack.c.l.bf16 %v2631_v12  ;;  %v47_v41 = vunpack.c.h.bf16 %v2631_v12  ;;  %v31_v54 = vld [vmem:[%s3038_s0 + $0x28] sm:$0xff]  ;;  %v2366_v55 = vld [vmem:[%s3037_s1 + $0x158] sm:$0xff] }
  0x1a   :  { %1604 = vmatpush.bf16.msra.mxu0 %v2324_v30  ;;  %v153_v14 = vrot.slane %v152_v2, 2  ;;  %v160_v15 = vrot.slane %v159_v3, 2  ;;  %v167_v16 = vrot.slane %v166_v4, 2  ;;  %v174_v19 = vrot.slane %v173_v9, 2  ;;  %v2374_v56 = vld [vmem:[%s3037_s1 + $0x198] sm:$0xff] }
  0x1b   :  { %1617 = vmatpush.bf16.msra.mxu1 %v2332_v31 }
  0x1c   :  { %1630 = vmatpush.bf16.msra.mxu2 %v2340_v32  ;;  %v85_v20 = vld.sshfl [vmem:[#allocation1] sm:$0xff pattern:$0x75316420]  ;;  %v86_v21 = vld.sshfl [vmem:[#allocation1 + $0x8] sm:$0xff pattern:$0x75316420]  ;;  %v154_v22 = vadd.f32 %v153_v14, %v152_v2  ;;  %v161_v23 = vadd.f32 %v160_v15, %v159_v3  ;;  %v168_v24 = vadd.f32 %v167_v16, %v166_v4  ;;  %v175_v30 = vadd.f32 %v174_v19, %v173_v9 }
  0x1d   :  { %1643 = vmatpush.bf16.msra.mxu3 %v2348_v33  ;;  %v87_v28 = vld.sshfl [vmem:[#allocation1 + $0x10] sm:$0xff pattern:$0x75316420]  ;;  %v88_v29 = vld.sshfl [vmem:[#allocation1 + $0x18] sm:$0xff pattern:$0x75316420] }
  0x1e   :  { %1605 = vmatpush.bf16.msra.mxu0 %v2323_v35  ;;  %93 = vst [vmem:[#allocation1] ss:$2 sm:$0xff] %v42_v13  ;;  %v155_v31 = vrot.slane %v154_v22, 1  ;;  %v162_v32 = vrot.slane %v161_v23, 1  ;;  %v169_v33 = vrot.slane %v168_v24, 1  ;;  %v206_v34 = vsel %vm149_vm0, %v85_v20, 0.0 }
  0x1f   :  { %1618 = vmatpush.bf16.msra.mxu1 %v2331_v36  ;;  %94 = vst [vmem:[#allocation1 + $0x10] ss:$2 sm:$0xff] %v43_v18  ;;  %v176_v35 = vrot.slane %v175_v30, 1  ;;  %v207_v36 = vrot.slane %v206_v34, 4  ;;  %v227_v48 = vsel %vm149_vm0, %v88_v29, 0.0  ;;  %v2357_v3 = vld [vmem:[%s3037_s1 + $0x110] sm:$0xff]  ;;  %v45_v20 = vunpack.c.h.bf16 %v31_v54 }
  0x20   :  { %1631 = vmatpush.bf16.msra.mxu2 %v2339_v37  ;;  %v213_v37 = vsel %vm149_vm0, %v86_v21, 0.0  ;;  %v156_v50 = vadd.f32 %v155_v31, %v154_v22  ;;  %v2669_v0 = vld.sshfl [vmem:[#allocation1 + $0x20] sm:$0xff pattern:$0x75316420]  ;;  %v2365_v4 = vld [vmem:[%s3037_s1 + $0x150] sm:$0xff] }
  0x21   :  { %1644 = vmatpush.bf16.msra.mxu3 %v2347_v38  ;;  %v220_v38 = vsel %vm149_vm0, %v87_v28, 0.0  ;;  %v177_v45 = vadd.f32 %v176_v35, %v175_v30  ;;  %v208_v46 = vadd.f32 %v207_v36, %v206_v34  ;;  %v2671_v2 = vld.sshfl [vmem:[#allocation1 + $0x28] sm:$0xff pattern:$0x75316420]  ;;  %v2373_v15 = vld [vmem:[%s3037_s1 + $0x190] sm:$0xff] }
  0x22   :  { %1650 = vmatpush.bf16.msrb.mxu0 %v2362_v39  ;;  %v2375_v39 = vld [vmem:[%s3037_s1 + $0x1a0] sm:$0xff]  ;;  %v221_v47 = vrot.slane %v220_v38, 4  ;;  %v2679_v13 = vld.sshfl [vmem:[#allocation1 + $0x30] sm:$0xff pattern:$0x75316420] }
  0x23   :  { %1663 = vmatpush.bf16.msrb.mxu1 %v2370_v42  ;;  %v163_v42 = vadd.f32 %v162_v32, %v161_v23  ;;  %v209_v58 = vrot.slane %v208_v46, 2  ;;  %v408_v61 = vrot.slane %v177_v45, 2  ;;  %v2681_v14 = vld.sshfl [vmem:[#allocation1 + $0x38] sm:$0xff pattern:$0x75316420]  ;;  %v2381_v21 = vld [vmem:[%s3037_s1 + $0x1d0] sm:$0xff] }
  0x24   :  { %1676 = vmatpush.bf16.msrb.mxu2 %v2378_v43  ;;  %v170_v43 = vadd.f32 %v169_v33, %v168_v24  ;;  %v222_v59 = vadd.f32 %v221_v47, %v220_v38  ;;  %96 = vst [vmem:[#allocation1 + $0x30] ss:$2 sm:$0xff] %v45_v20  ;;  %v2364_v38 = vld [vmem:[%s3037_s1 + $0x148] sm:$0xff]  ;;  %v2714_v47 = vld [vmem:[%s3038_s0 + $0x38] sm:$0xff] }
  0x25   :  { %1689 = vmatpush.bf16.msrb.mxu3 %v2386_v44  ;;  %v214_v44 = vrot.slane %v213_v37, 4  ;;  %v406_v53 = vrot.slane %v163_v42, 6  ;;  %v210_v9 = vadd.f32 %v209_v58, %v208_v46 }
  0x26   :  { %1651 = vmatpush.bf16.msrb.mxu0 %v2361_v51  ;;  %v407_v60 = vrot.slane %v170_v43, 4  ;;  %v99_v16 = vld.sshfl [vmem:[#allocation1 + $0x10] sm:$0xff pattern:$0x75316420]  ;;  %v223_v22 = vrot.slane %v222_v59, 2  ;;  %v2372_v43 = vld [vmem:[%s3037_s1 + $0x188] sm:$0xff] }
  0x27   :  { %1664 = vmatpush.bf16.msrb.mxu1 %v2369_v52  ;;  %v215_v51 = vadd.f32 %v214_v44, %v213_v37  ;;  %v228_v52 = vrot.slane %v227_v48, 4  ;;  %v431_v19 = vsel %vm430_vm1, %v156_v50, %v406_v53  ;;  %v276_v30 = vsel %vm149_vm0, %v99_v16, 0.0  ;;  %v2356_v37 = vld [vmem:[%s3037_s1 + $0x108] sm:$0xff] }
  0x28   :  { %1677 = vmatpush.bf16.msrb.mxu2 %v2377_v57  ;;  %v2382_v57 = vld [vmem:[%s3037_s1 + $0x1d8] sm:$0xff]  ;;  %v211_v31 = vrot.slane %v210_v9, 1  ;;  %v224_v32 = vadd.f32 %v223_v22, %v222_v59  ;;  %v277_v35 = vrot.slane %v276_v30, 4  ;;  %v2380_v44 = vld [vmem:[%s3037_s1 + $0x1c8] sm:$0xff] }
  0x29   :  { %1690 = vmatpush.bf16.msrb.mxu3 %v2385_v62  ;;  %v216_v62 = vrot.slane %v215_v51, 2  ;;  %v229_v63 = vadd.f32 %v228_v52, %v227_v48  ;;  %v2363_v52 = vld [vmem:[%s3037_s1 + $0x140] sm:$0xff] }
  0x2a   :  { %1652 = vmatpush.bf16.msrb.mxu0 %v2360_v7  ;;  %v97_v7 = vld.sshfl [vmem:[#allocation1] sm:$0xff pattern:$0x75316420]  ;;  %v278_v46 = vadd.f32 %v277_v35, %v276_v30 }
  0x2b   :  { %1665 = vmatpush.bf16.msrb.mxu1 %v2368_v8  ;;  %v98_v8 = vld.sshfl [vmem:[#allocation1 + $0x8] sm:$0xff pattern:$0x75316420]  ;;  %v217_v18 = vadd.f32 %v216_v62, %v215_v51  ;;  %v230_v23 = vrot.slane %v229_v63, 2  ;;  %v262_v24 = vsel %vm149_vm0, %v97_v7, 0.0  ;;  %v2355_v51 = vld [vmem:[%s3037_s1 + $0x100] sm:$0xff]  ;;  %v48_v62 = vunpack.c.l.bf16 %v2714_v47 }
  0x2c   :  { %1678 = vmatpush.bf16.msrb.mxu2 %v2376_v11  ;;  %v44_v11 = vunpack.c.l.bf16 %v31_v54  ;;  %105 = vst [vmem:[#allocation1] ss:$2 sm:$0xff] %v46_v27  ;;  %v263_v28 = vrot.slane %v262_v24, 4  ;;  %v269_v29 = vsel %vm149_vm0, %v98_v8, 0.0  ;;  %v212_v54 = vadd.f32 %v211_v31, %v210_v9 }
  0x2d   :  { %1691 = vmatpush.bf16.msrb.mxu3 %v2384_v17  ;;  %v100_v17 = vld.sshfl [vmem:[#allocation1 + $0x18] sm:$0xff pattern:$0x75316420]  ;;  %v231_v33 = vadd.f32 %v230_v23, %v229_v63  ;;  %v270_v12 = vrot.slane %v269_v29, 4  ;;  %v49_v63 = vunpack.c.h.bf16 %v2714_v47  ;;  %v279_v8 = vrot.slane %v278_v46, 2 }
  0x2e   :  { %1653 = vmatpush.bf16.msrb.mxu0 %v2359_v25  ;;  %v433_v25 = vsel %vm432_vm2, %v407_v60, %v408_v61  ;;  %106 = vst [vmem:[#allocation1 + $0x10] ss:$2 sm:$0xff] %v47_v41  ;;  %v264_v34 = vadd.f32 %v263_v28, %v262_v24  ;;  %v283_v36 = vsel %vm149_vm0, %v100_v17, 0.0 }
  0x2f   :  { %1666 = vmatpush.bf16.msrb.mxu1 %v2367_v26  ;;  %v218_v26 = vrot.slane %v217_v18, 1  ;;  %95 = vst [vmem:[#allocation1 + $0x20] ss:$2 sm:$0xff] %v44_v11  ;;  %v271_v41 = vadd.f32 %v270_v12, %v269_v29  ;;  %v284_v42 = vrot.slane %v283_v36, 4  ;;  %v2717_v50 = vsel %vm149_vm0, %v431_v19, %v433_v25 }
  0x30   :  { %1679 = vmatpush.bf16.msrb.mxu2 %v2375_v39  ;;  %v225_v39 = vrot.slane %v224_v32, 1  ;;  %v265_v45 = vrot.slane %v264_v34, 2 }
  0x31   :  { %1692 = vmatpush.bf16.msrb.mxu3 %v2383_v40  ;;  %v2696_v27 = vadd.f32 %v218_v26, %v217_v18  ;;  %v232_v40 = vrot.slane %v231_v33, 1  ;;  %v272_v48 = vrot.slane %v271_v41, 2 }
  0x32   :  { %1654 = vmatpush.bf16.msrb.mxu0 %v2358_v49  ;;  %v285_v49 = vadd.f32 %v284_v42, %v283_v36 }
  0x33   :  { %1667 = vmatpush.bf16.msrb.mxu1 %v2366_v55  ;;  %v109_v53 = vld.sshfl [vmem:[#allocation1] sm:$0xff pattern:$0x75316420]  ;;  %v2725_v55 = vadd.f32 %v225_v39, %v224_v32  ;;  %v110_v58 = vld.sshfl [vmem:[#allocation1 + $0x8] sm:$0xff pattern:$0x75316420]  ;;  %v233_v60 = vadd.f32 %v232_v40, %v231_v33  ;;  %v273_v61 = vadd.f32 %v272_v48, %v271_v41 }
  0x34   :  { %1680 = vmatpush.bf16.msrb.mxu2 %v2374_v56  ;;  %v266_v56 = vadd.f32 %v265_v45, %v264_v34  ;;  %v286_v9 = vrot.slane %v285_v49, 2  ;;  %v318_v11 = vsel %vm149_vm0, %v109_v53, 0.0  ;;  %v325_v17 = vsel %vm149_vm0, %v110_v58, 0.0  ;;  %v2746_v45 = vld.sshfl [vmem:[#allocation1 + $0x30] sm:$0xff pattern:$0x75316420] }
  0x35   :  { %1693 = vmatpush.bf16.msrb.mxu3 %v2382_v57  ;;  %v412_v57 = vrot.slane %v2696_v27, 6  ;;  %v111_v59 = vld.sshfl [vmem:[#allocation1 + $0x10] sm:$0xff pattern:$0x75316420]  ;;  %v319_v16 = vrot.slane %v318_v11, 4  ;;  %v326_v23 = vrot.slane %v325_v17, 4 }
  0x36   :  { %1655 = vmatpush.bf16.msrb.mxu0 %v2357_v3  ;;  %v2371_v3 = vld [vmem:[%s3037_s1 + $0x180] sm:$0xff]  ;;  %v267_v7 = vrot.slane %v266_v56, 1  ;;  %v332_v18 = vsel %vm149_vm0, %v111_v59, 0.0  ;;  %v112_v19 = vld.sshfl [vmem:[#allocation1 + $0x18] sm:$0xff pattern:$0x75316420]  ;;  %v287_v22 = vadd.f32 %v286_v9, %v285_v49 }
  0x37   :  { %1668 = vmatpush.bf16.msrb.mxu1 %v2365_v4  ;;  %v2379_v4 = vld [vmem:[%s3037_s1 + $0x1c0] sm:$0xff]  ;;  %v320_v25 = vadd.f32 %v319_v16, %v318_v11  ;;  %v333_v26 = vrot.slane %v332_v18, 4  ;;  %v339_v28 = vsel %vm149_vm0, %v112_v19, 0.0  ;;  %v327_v32 = vadd.f32 %v326_v23, %v325_v17  ;;  %v2742_v12 = vld.sshfl [vmem:[#allocation1 + $0x28] sm:$0xff pattern:$0x75316420] }
  0x38   :  { %1681 = vmatpush.bf16.msrb.mxu2 %v2373_v15  ;;  %v274_v15 = vrot.slane %v273_v61, 1  ;;  %v268_v20 = vadd.f32 %v267_v7, %v266_v56  ;;  %v2740_v29 = vld.sshfl [vmem:[#allocation1 + $0x20] sm:$0xff pattern:$0x75316420]  ;;  %v288_v31 = vrot.slane %v287_v22, 1  ;;  %v340_v33 = vrot.slane %v339_v28, 4 }
  0x39   :  { %1694 = vmatpush.bf16.msrb.mxu3 %v2381_v21  ;;  %v280_v21 = vadd.f32 %v279_v8, %v278_v46  ;;  %v321_v27 = vrot.slane %v320_v25, 2  ;;  %v334_v34 = vadd.f32 %v333_v26, %v332_v18  ;;  %v413_v35 = vrot.slane %v2725_v55, 4  ;;  %107 = vst [vmem:[#allocation1 + $0x20] ss:$2 sm:$0xff] %v48_v62 }
  0x3a   :  { %1656 = vmatpush.bf16.msrb.mxu0 %v2356_v37  ;;  %v275_v24 = vadd.f32 %v274_v15, %v273_v61  ;;  %v414_v36 = vrot.slane %v233_v60, 2  ;;  %v328_v39 = vrot.slane %v327_v32, 2  ;;  %v341_v40 = vadd.f32 %v340_v33, %v339_v28 }
  0x3b   :  { %1669 = vmatpush.bf16.msrb.mxu1 %v2364_v38  ;;  %v281_v30 = vrot.slane %v280_v21, 1  ;;  %v289_v38 = vadd.f32 %v288_v31, %v287_v22  ;;  %v322_v41 = vadd.f32 %v321_v27, %v320_v25  ;;  %v335_v42 = vrot.slane %v334_v34, 2 }
  0x3c   :  { %1682 = vmatpush.bf16.msrb.mxu2 %v2372_v43  ;;  %v418_v43 = vrot.slane %v275_v24, 6  ;;  %v329_v46 = vadd.f32 %v328_v39, %v327_v32  ;;  %v342_v47 = vrot.slane %v341_v40, 2  ;;  %v439_v55 = vsel %vm432_vm2, %v413_v35, %v414_v36 }
  0x3d   :  { %1695 = vmatpush.bf16.msrb.mxu3 %v2380_v44  ;;  %v282_v37 = vadd.f32 %v281_v30, %v280_v21  ;;  %v438_v44 = vsel %vm430_vm1, %v212_v54, %v412_v57  ;;  %v420_v49 = vrot.slane %v289_v38, 2  ;;  %v336_v53 = vadd.f32 %v335_v42, %v334_v34 }
  0x3e   :  { %1657 = vmatpush.bf16.msrb.mxu0 %v2355_v51  ;;  %v2748_v51 = vld.sshfl [vmem:[#allocation1 + $0x38] sm:$0xff pattern:$0x75316420]  ;;  %v444_v56 = vsel %vm430_vm1, %v268_v20, %v418_v43  ;;  %v330_v58 = vrot.slane %v329_v46, 1  ;;  %v343_v59 = vadd.f32 %v342_v47, %v341_v40  ;;  %v178_v62 = vsel %vm149_vm0, %v2611_v1, 0.0 }
  0x3f   :  { %1670 = vmatpush.bf16.msrb.mxu1 %v2363_v52  ;;  %v419_v48 = vrot.slane %v282_v37, 4  ;;  %v323_v52 = vrot.slane %v322_v41, 1  ;;  %108 = vst [vmem:[#allocation1 + $0x30] ss:$2 sm:$0xff] %v49_v63  ;;  %v337_v57 = vrot.slane %v336_v53, 1  ;;  %v179_v8 = vrot.slane %v178_v62, 4 }
  0x40   :  { %1683 = vmatpush.bf16.msrb.mxu2 %v2371_v3  ;;  %v331_v3 = vadd.f32 %v330_v58, %v329_v46  ;;  %v185_v63 = vsel %vm149_vm0, %v2613_v5, 0.0  ;;  %v192_v11 = vsel %vm149_vm0, %v2615_v6, 0.0  ;;  %v199_v15 = vsel %vm149_vm0, %v2623_v10, 0.0 }
  0x41   :  { %1696 = vmatpush.bf16.msrb.mxu3 %v2379_v4  ;;  %v445_v60 = vsel %vm432_vm2, %v419_v48, %v420_v49  ;;  %v324_v54 = vadd.f32 %v323_v52, %v322_v41  ;;  %v344_v4 = vrot.slane %v343_v59, 1  ;;  %v338_v9 = vadd.f32 %v337_v57, %v336_v53 }
  0x42   :  { %v446_v61 = vsel %vm149_vm0, %v444_v56, %v445_v60  ;;  %v424_v17 = vrot.slane %v331_v3, 6  ;;  %v180_v1 = vadd.f32 %v179_v8, %v178_v62  ;;  %v186_v21 = vrot.slane %v185_v63, 4 }
  0x43   :  { %v460_v7 = vrot.slane %v446_v61, 7  ;;  %v345_v16 = vadd.f32 %v344_v4, %v343_v59  ;;  %v425_v19 = vrot.slane %v338_v9, 4  ;;  %v193_v22 = vrot.slane %v192_v11, 4  ;;  %v2394_v59 = vld [vmem:[%s3037_s1 + $0x238] sm:$0xff] }
  0x44   :  { %v450_v5 = vsel %vm430_vm1, %v324_v54, %v424_v17  ;;  %v181_v6 = vrot.slane %v180_v1, 2  ;;  %v187_v10 = vadd.f32 %v186_v21, %v185_v63  ;;  %v200_v28 = vrot.slane %v199_v15, 4  ;;  %v2418_v17 = vld [vmem:[%s3037_s1 + $0x2f8] sm:$0xff] }
  0x45   :  { %v462_v18 = vsel %vm461_vm3, %v460_v7, %v2717_v50  ;;  %v426_v23 = vrot.slane %v345_v16, 2  ;;  %v194_v26 = vadd.f32 %v193_v22, %v192_v11  ;;  %v440_v30 = vsel %vm149_vm0, %v438_v44, %v439_v55  ;;  %v2410_v16 = vld [vmem:[%s3037_s1 + $0x2b8] sm:$0xff] }
  0x46   :  { %v464_v20 = vsel %vm463_vm4, %v460_v7, %v462_v18  ;;  %v234_v32 = vsel %vm149_vm0, %v2669_v0, 0.0  ;;  %v188_v27 = vrot.slane %v187_v10, 2  ;;  %v201_v35 = vadd.f32 %v200_v28, %v199_v15 }
  0x47   :  { %v466_v24 = vsel %vm465_vm5, %v460_v7, %v464_v20  ;;  %v451_v50 = vsel %vm432_vm2, %v425_v19, %v426_v23  ;;  %v195_v34 = vrot.slane %v194_v26, 2  ;;  %v182_v37 = vadd.f32 %v181_v6, %v180_v1  ;;  %v2393_v23 = vld [vmem:[%s3037_s1 + $0x230] sm:$0xff] }
  0x48   :  { %v468_v25 = vsel %vm467_vm6, %v460_v7, %v466_v24  ;;  %v452_v33 = vsel %vm149_vm0, %v450_v5, %v451_v50  ;;  %v235_v38 = vrot.slane %v234_v32, 4  ;;  %v241_v39 = vsel %vm149_vm0, %v2671_v2, 0.0  ;;  %v2401_v5 = vld [vmem:[%s3037_s1 + $0x270] sm:$0xff] }
  0x49   :  { %v509_v31 = vmul.f32 0.25, %v468_v25  ;;  %v478_v36 = vrot.slane %v452_v33, 7  ;;  %v189_v40 = vadd.f32 %v188_v27, %v187_v10  ;;  %v202_v41 = vrot.slane %v201_v35, 2  ;;  %v2417_v50 = vld [vmem:[%s3037_s1 + $0x2f0] sm:$0xff] }
  0x4a   :  { %v242_v42 = vrot.slane %v241_v39, 4  ;;  %v196_v44 = vadd.f32 %v195_v34, %v194_v26  ;;  %v236_v46 = vadd.f32 %v235_v38, %v234_v32  ;;  %v248_v0 = vsel %vm149_vm0, %v2679_v13, 0.0  ;;  %v2402_v13 = vld [vmem:[%s3037_s1 + $0x278] sm:$0xff]  ;;  %v2400_v38 = vld [vmem:[%s3037_s1 + $0x268] sm:$0xff] }
  0x4b   :  { %517 = vst [vmem:[#allocation1] ss:$4 sm:$0xff] %v509_v31  ;;  %v479_v43 = vsel %vm461_vm3, %v478_v36, %v440_v30  ;;  %v203_v48 = vadd.f32 %v202_v41, %v201_v35  ;;  %v183_v52 = vrot.slane %v182_v37, 1  ;;  %v249_v53 = vrot.slane %v248_v0, 4  ;;  %v2409_v30 = vld [vmem:[%s3037_s1 + $0x2b0] sm:$0xff] }
  0x4c   :  { %v480_v47 = vsel %vm463_vm4, %v478_v36, %v479_v43  ;;  %v190_v2 = vrot.slane %v189_v40, 1  ;;  %v243_v56 = vadd.f32 %v242_v42, %v241_v39  ;;  %v197_v60 = vrot.slane %v196_v44, 1  ;;  %v114_v31 = vld.sshfl [vmem:[#allocation1 + $0x28] sm:$0xff pattern:$0x75316420] }
  0x4d   :  { %v481_v49 = vsel %vm465_vm5, %v478_v36, %v480_v47  ;;  %v204_v54 = vrot.slane %v203_v48, 1  ;;  %v237_v57 = vrot.slane %v236_v46, 2  ;;  %v250_v3 = vadd.f32 %v249_v53, %v248_v0  ;;  %v115_v43 = vld.sshfl [vmem:[#allocation1 + $0x30] sm:$0xff pattern:$0x75316420] }
  0x4e   :  { %v482_v55 = vsel %vm467_vm6, %v478_v36, %v481_v49  ;;  %v2787_v63 = vadd.f32 %v183_v52, %v182_v37  ;;  %v2795_v18 = vadd.f32 %v190_v2, %v189_v40  ;;  %v244_v1 = vrot.slane %v243_v56, 2  ;;  %v2392_v37 = vld [vmem:[%s3037_s1 + $0x228] sm:$0xff] }
  0x4f   :  { %v511_v58 = vmul.f32 0.25, %v482_v55  ;;  %v2797_v19 = vadd.f32 %v197_v60, %v196_v44  ;;  %v255_v20 = vsel %vm149_vm0, %v2681_v14, 0.0  ;;  %v290_v21 = vsel %vm149_vm0, %v2740_v29, 0.0  ;;  %v113_v29 = vld.sshfl [vmem:[#allocation1 + $0x20] sm:$0xff pattern:$0x75316420] }
  0x50   :  { %v297_v22 = vsel %vm149_vm0, %v2742_v12, 0.0  ;;  %v2811_v24 = vadd.f32 %v237_v57, %v236_v46  ;;  %v251_v6 = vrot.slane %v250_v3, 2  ;;  %v256_v14 = vrot.slane %v255_v20, 4  ;;  %v2416_v49 = vld [vmem:[%s3037_s1 + $0x2e8] sm:$0xff] }
  0x51   :  { %v291_v25 = vrot.slane %v290_v21, 4  ;;  %v2813_v10 = vadd.f32 %v204_v54, %v203_v48  ;;  %v298_v12 = vrot.slane %v297_v22, 4  ;;  %v304_v26 = vsel %vm149_vm0, %v2746_v45, 0.0  ;;  %v2408_v48 = vld [vmem:[%s3037_s1 + $0x2a8] sm:$0xff] }
  0x52   :  { %v520_v61 = vld.sshfl [vmem:[#allocation1] sm:$0xff pattern:$0x73625140]  ;;  %v521_v62 = vld.sshfl [vmem:[#allocation1 + $0x8] sm:$0xff pattern:$0x73625140]  ;;  %v2825_v32 = vadd.f32 %v244_v1, %v243_v56  ;;  %v257_v33 = vadd.f32 %v256_v14, %v255_v20  ;;  %v2835_v39 = vadd.f32 %v251_v6, %v250_v3 }
  0x53   :  { %v554_v4 = vpack.c.bf16 %v520_v61, %v520_v61  ;;  %v555_v7 = vpack.c.bf16 %v521_v62, %v521_v62  ;;  %v522_v8 = vld.sshfl [vmem:[#allocation1 + $0x10] sm:$0xff pattern:$0x73625140]  ;;  %v523_v9 = vld.sshfl [vmem:[#allocation1 + $0x18] sm:$0xff pattern:$0x73625140]  ;;  %v292_v27 = vadd.f32 %v291_v25, %v290_v21  ;;  %v299_v45 = vadd.f32 %v298_v12, %v297_v22 }
  0x54   :  { %v556_v11 = vpack.c.bf16 %v522_v8, %v522_v8  ;;  %v557_v15 = vpack.c.bf16 %v523_v9, %v523_v9  ;;  %528 = vst [vmem:[#allocation1] ss:$4 sm:$0xff] %v511_v58  ;;  %v311_v28 = vsel %vm149_vm0, %v2748_v51, 0.0  ;;  %v305_v34 = vrot.slane %v304_v26, 4  ;;  %v2391_v62 = vld [vmem:[%s3037_s1 + $0x220] sm:$0xff] }
  0x55   :  { %1606 = vmatmul.bf16.vlgmr.msra.gmra.mxu0 %v554_v4  ;;  %1619 = vmatmul.bf16.vlgmr.msra.gmra.mxu1 %v555_v7  ;;  %v312_v35 = vrot.slane %v311_v28, 4  ;;  %v346_v51 = vsel %vm149_vm0, %v113_v29, 0.0  ;;  %v353_v36 = vsel %vm149_vm0, %v114_v31, 0.0  ;;  %v258_v40 = vrot.slane %v257_v33, 2  ;;  %v2399_v3 = vld [vmem:[%s3037_s1 + $0x260] sm:$0xff]  ;;  %v2390_v31 = vld [vmem:[%s3037_s1 + $0x218] sm:$0xff] }
  0x56   :  { %1632 = vmatmul.bf16.vlgmr.msra.gmra.mxu2 %v556_v11  ;;  %1645 = vmatmul.bf16.vlgmr.msra.gmra.mxu3 %v557_v15  ;;  %v293_v41 = vrot.slane %v292_v27, 2  ;;  %v306_v42 = vadd.f32 %v305_v34, %v304_v26  ;;  %v300_v44 = vrot.slane %v299_v45, 2  ;;  %v347_v0 = vrot.slane %v346_v51, 4  ;;  %v2407_v11 = vld [vmem:[%s3037_s1 + $0x2a0] sm:$0xff] }
  0x57   :  { %1702 = vmatpush.bf16.msra.mxu0 %v2394_v59  ;;  %1715 = vmatpush.bf16.msra.mxu1 %v2402_v13  ;;  %v313_v46 = vadd.f32 %v312_v35, %v311_v28  ;;  %v354_v47 = vrot.slane %v353_v36, 4  ;;  %v259_v52 = vadd.f32 %v258_v40, %v257_v33  ;;  %v360_v2 = vsel %vm149_vm0, %v115_v43, 0.0  ;;  %v2415_v15 = vld [vmem:[%s3037_s1 + $0x2e0] sm:$0xff]  ;;  %v116_v21 = vld.sshfl [vmem:[#allocation1 + $0x38] sm:$0xff pattern:$0x75316420] }
  0x58   :  { %1728 = vmatpush.bf16.msra.mxu2 %v2410_v16  ;;  %1741 = vmatpush.bf16.msra.mxu3 %v2418_v17  ;;  %v294_v53 = vadd.f32 %v293_v41, %v292_v27  ;;  %v307_v55 = vrot.slane %v306_v42, 2  ;;  %v301_v56 = vadd.f32 %v300_v44, %v299_v45  ;;  %v348_v59 = vadd.f32 %v347_v0, %v346_v51  ;;  %v2398_v33 = vld [vmem:[%s3037_s1 + $0x258] sm:$0xff] }
  0x59   :  { %v314_v58 = vrot.slane %v313_v46, 2  ;;  %v355_v13 = vadd.f32 %v354_v47, %v353_v36  ;;  %v239_v60 = vrot.slane %v2811_v24, 1  ;;  %v246_v54 = vrot.slane %v2825_v32, 1  ;;  %v2406_v35 = vld [vmem:[%s3037_s1 + $0x298] sm:$0xff] }
  0x5a   :  { %v308_v57 = vadd.f32 %v307_v55, %v306_v42  ;;  %v361_v61 = vrot.slane %v360_v2, 4  ;;  %v302_v4 = vrot.slane %v301_v56, 1  ;;  %v349_v8 = vrot.slane %v348_v59, 2  ;;  %v2414_v40 = vld [vmem:[%s3037_s1 + $0x2d8] sm:$0xff] }
  0x5b   :  { %1703 = vmatpush.bf16.msra.mxu0 %v2393_v23  ;;  %1716 = vmatpush.bf16.msra.mxu1 %v2401_v5  ;;  %v315_v7 = vadd.f32 %v314_v58, %v313_v46  ;;  %v356_v9 = vrot.slane %v355_v13, 2  ;;  %v253_v16 = vrot.slane %v2835_v39, 1  ;;  %v260_v17 = vrot.slane %v259_v52, 1  ;;  %v2397_v46 = vld [vmem:[%s3037_s1 + $0x250] sm:$0xff] }
  0x5c   :  { %1729 = vmatpush.bf16.msra.mxu2 %v2409_v30  ;;  %1742 = vmatpush.bf16.msra.mxu3 %v2417_v50  ;;  %v309_v1 = vrot.slane %v308_v57, 1  ;;  %v362_v20 = vadd.f32 %v361_v61, %v360_v2  ;;  %v295_v22 = vrot.slane %v294_v53, 1  ;;  %v303_v23 = vadd.f32 %v302_v4, %v301_v56  ;;  %v2388_v61 = vld [vmem:[%s3037_s1 + $0x208] sm:$0xff] }
  0x5d   :  { %v316_v5 = vrot.slane %v315_v7, 1  ;;  %v357_v6 = vadd.f32 %v356_v9, %v355_v13  ;;  %v350_v25 = vadd.f32 %v349_v8, %v348_v59  ;;  %v367_v12 = vsel %vm149_vm0, %v116_v21, 0.0  ;;  %v2404_v4 = vld [vmem:[%s3037_s1 + $0x288] sm:$0xff]  ;;  %v2387_v21 = vld [vmem:[%s3037_s1 + $0x200] sm:$0xff] }
  0x5e   :  { %v310_v14 = vadd.f32 %v309_v1, %v308_v57  ;;  %v363_v29 = vrot.slane %v362_v20, 2  ;;  %v247_v26 = vadd.f32 %v246_v54, %v2825_v32  ;;  %v368_v50 = vrot.slane %v367_v12, 4  ;;  %v2412_v9 = vld [vmem:[%s3037_s1 + $0x2c8] sm:$0xff] }
  0x5f   :  { %1704 = vmatpush.bf16.msra.mxu0 %v2392_v37  ;;  %1717 = vmatpush.bf16.msra.mxu1 %v2400_v38  ;;  %v317_v28 = vadd.f32 %v316_v5, %v315_v7  ;;  %v358_v30 = vrot.slane %v357_v6, 1  ;;  %v409_v34 = vrot.slane %v2795_v18, 6  ;;  %v410_v45 = vrot.slane %v2797_v19, 4  ;;  %v2403_v5 = vld [vmem:[%s3037_s1 + $0x280] sm:$0xff] }
  0x60   :  { %1730 = vmatpush.bf16.msra.mxu2 %v2408_v48  ;;  %1743 = vmatpush.bf16.msra.mxu3 %v2416_v49  ;;  %v364_v27 = vadd.f32 %v363_v29, %v362_v20  ;;  %v411_v32 = vrot.slane %v2813_v10, 2  ;;  %v254_v51 = vadd.f32 %v253_v16, %v2835_v39  ;;  %v261_v36 = vadd.f32 %v260_v17, %v259_v52  ;;  %v2389_v39 = vld [vmem:[%s3037_s1 + $0x210] sm:$0xff] }
  0x61   :  { %v296_v37 = vadd.f32 %v295_v22, %v294_v53  ;;  %v369_v38 = vadd.f32 %v368_v50, %v367_v12  ;;  %v351_v41 = vrot.slane %v350_v25, 1  ;;  %v421_v18 = vrot.slane %v303_v23, 6  ;;  %v2405_v49 = vld [vmem:[%s3037_s1 + $0x290] sm:$0xff]  ;;  %v2395_v22 = vld [vmem:[%s3037_s1 + $0x240] sm:$0xff] }
  0x62   :  { %v365_v42 = vrot.slane %v364_v27, 1  ;;  %v422_v43 = vrot.slane %v310_v14, 4  ;;  %v359_v19 = vadd.f32 %v358_v30, %v357_v6  ;;  %v423_v10 = vrot.slane %v317_v28, 2 }
  0x63   :  { %1705 = vmatpush.bf16.msra.mxu0 %v2391_v62  ;;  %1718 = vmatpush.bf16.msra.mxu1 %v2399_v3  ;;  %v370_v44 = vrot.slane %v369_v38, 2  ;;  %v240_v0 = vadd.f32 %v239_v60, %v2811_v24  ;;  %v435_v47 = vsel %vm430_vm1, %v2787_v63, %v409_v34  ;;  %v436_v48 = vsel %vm432_vm2, %v410_v45, %v411_v32  ;;  %v2413_v24 = vld [vmem:[%s3037_s1 + $0x2d0] sm:$0xff]  ;;  %v2396_v62 = vld [vmem:[%s3037_s1 + $0x248] sm:$0xff]  ;;  %v2426_v34 = vld [vmem:[%s3037_s1 + $0x338] sm:$0xff] }
  0x64   :  { %1731 = vmatpush.bf16.msra.mxu2 %v2407_v11  ;;  %1744 = vmatpush.bf16.msra.mxu3 %v2415_v15  ;;  %v366_v52 = vadd.f32 %v365_v42, %v364_v27  ;;  %v415_v55 = vrot.slane %v247_v26, 6  ;;  %v447_v2 = vsel %vm430_vm1, %v296_v37, %v421_v18  ;;  %v352_v56 = vadd.f32 %v351_v41, %v350_v25  ;;  %v2411_v25 = vld [vmem:[%s3037_s1 + $0x2c0] sm:$0xff]  ;;  %v2434_v45 = vld [vmem:[%s3037_s1 + $0x378] sm:$0xff] }
  0x65   :  { %v371_v53 = vadd.f32 %v370_v44, %v369_v38  ;;  %v416_v58 = vrot.slane %v254_v51, 4  ;;  %v417_v63 = vrot.slane %v261_v36, 2  ;;  %v448_v59 = vsel %vm432_vm2, %v422_v43, %v423_v10  ;;  %v2442_v42 = vld [vmem:[%s3037_s1 + $0x3b8] sm:$0xff]  ;;  %v2425_v43 = vld [vmem:[%s3037_s1 + $0x330] sm:$0xff] }
  0x66   :  { %v427_v60 = vrot.slane %v359_v19, 6  ;;  %v437_v54 = vsel %vm149_vm0, %v435_v47, %v436_v48  ;;  %v449_v57 = vsel %vm149_vm0, %v447_v2, %v448_v59  ;;  %v428_v8 = vrot.slane %v366_v52, 4  ;;  %v2450_v18 = vld [vmem:[%s3037_s1 + $0x3f8] sm:$0xff]  ;;  %v2433_v19 = vld [vmem:[%s3037_s1 + $0x370] sm:$0xff]  ;;  %v2448_v47 = vld [vmem:[%s3037_s1 + $0x3e8] sm:$0xff] }
  0x67   :  { %1706 = vmatpush.bf16.msra.mxu0 %v2390_v31  ;;  %1719 = vmatpush.bf16.msra.mxu1 %v2398_v33  ;;  %v372_v13 = vrot.slane %v371_v53, 1  ;;  %v471_v3 = vrot.slane %v449_v57, 7  ;;  %v441_v11 = vsel %vm430_vm1, %v240_v0, %v415_v55  ;;  %v442_v17 = vsel %vm432_vm2, %v416_v58, %v417_v63  ;;  %v2441_v44 = vld [vmem:[%s3037_s1 + $0x3b0] sm:$0xff]  ;;  %v2440_v0 = vld [vmem:[%s3037_s1 + $0x3a8] sm:$0xff]  ;;  %v2423_v55 = vld [vmem:[%s3037_s1 + $0x320] sm:$0xff] }
  0x68   :  { %1732 = vmatpush.bf16.msra.mxu2 %v2406_v35  ;;  %1745 = vmatpush.bf16.msra.mxu3 %v2414_v40  ;;  %v453_v1 = vsel %vm430_vm1, %v352_v56, %v427_v60  ;;  %v443_v29 = vsel %vm149_vm0, %v441_v11, %v442_v17  ;;  %v2449_v10 = vld [vmem:[%s3037_s1 + $0x3f0] sm:$0xff]  ;;  %v530_v48 = vld.sshfl [vmem:[#allocation1] sm:$0xff pattern:$0x73625140]  ;;  %v2422_v60 = vld [vmem:[%s3037_s1 + $0x318] sm:$0xff] }
  0x69   :  { %v373_v7 = vadd.f32 %v372_v13, %v371_v53  ;;  %v472_v15 = vsel %vm461_vm3, %v471_v3, %v437_v54  ;;  %v531_v52 = vld.sshfl [vmem:[#allocation1 + $0x8] sm:$0xff pattern:$0x73625140]  ;;  %v533_v53 = vld.sshfl [vmem:[#allocation1 + $0x18] sm:$0xff pattern:$0x73625140]  ;;  %v562_v58 = vpack.c.bf16 %v530_v48, %v530_v48 }
  0x6a   :  { %v473_v20 = vsel %vm463_vm4, %v471_v3, %v472_v15  ;;  %v2431_v2 = vld [vmem:[%s3037_s1 + $0x360] sm:$0xff]  ;;  %v563_v59 = vpack.c.bf16 %v531_v52, %v531_v52  ;;  %v565_v13 = vpack.c.bf16 %v533_v53, %v533_v53  ;;  %v2430_v54 = vld [vmem:[%s3037_s1 + $0x358] sm:$0xff]  ;;  %v2436_v11 = vld [vmem:[%s3037_s1 + $0x388] sm:$0xff] }
  0x6b   :  { %1707 = vmatpush.bf16.msra.mxu0 %v2389_v39  ;;  %1720 = vmatpush.bf16.msra.mxu1 %v2397_v46  ;;  %v429_v16 = vrot.slane %v373_v7, 2  ;;  %v474_v23 = vsel %vm465_vm5, %v471_v3, %v473_v20  ;;  %v2424_v39 = vld [vmem:[%s3037_s1 + $0x328] sm:$0xff]  ;;  %v2447_v56 = vld [vmem:[%s3037_s1 + $0x3e0] sm:$0xff]  ;;  %v2438_v57 = vld [vmem:[%s3037_s1 + $0x398] sm:$0xff] }
  0x6c   :  { %1733 = vmatpush.bf16.msra.mxu2 %v2405_v49  ;;  %1746 = vmatpush.bf16.msra.mxu3 %v2413_v24  ;;  %v475_v14 = vsel %vm467_vm6, %v471_v3, %v474_v23  ;;  %v2432_v46 = vld [vmem:[%s3037_s1 + $0x368] sm:$0xff]  ;;  %v532_v49 = vld.sshfl [vmem:[#allocation1 + $0x10] sm:$0xff pattern:$0x73625140]  ;;  %v2439_v24 = vld [vmem:[%s3037_s1 + $0x3a0] sm:$0xff] }
  0x6d   :  { %v454_v6 = vsel %vm432_vm2, %v428_v8, %v429_v16  ;;  %v510_v26 = vmul.f32 0.25, %v475_v14  ;;  %v564_v63 = vpack.c.bf16 %v532_v49, %v532_v49  ;;  %v2429_v3 = vld [vmem:[%s3037_s1 + $0x350] sm:$0xff]  ;;  %v2420_v8 = vld [vmem:[%s3037_s1 + $0x308] sm:$0xff]  ;;  %v2419_v16 = vld [vmem:[%s3037_s1 + $0x300] sm:$0xff] }
  0x6e   :  { %v455_v12 = vsel %vm149_vm0, %v453_v1, %v454_v6  ;;  %v2445_v7 = vld [vmem:[%s3037_s1 + $0x3d0] sm:$0xff]  ;;  %v2444_v15 = vld [vmem:[%s3037_s1 + $0x3c8] sm:$0xff]  ;;  %v2427_v17 = vld [vmem:[%s3037_s1 + $0x340] sm:$0xff] }
  0x6f   :  { %1708 = vmatpush.bf16.msra.mxu0 %v2388_v61  ;;  %1721 = vmatpush.bf16.msra.mxu1 %v2396_v62  ;;  %v485_v28 = vrot.slane %v455_v12, 7  ;;  %519 = vst [vmem:[#allocation1 + $0x20] ss:$4 sm:$0xff] %v510_v26  ;;  %v2446_v61 = vld [vmem:[%s3037_s1 + $0x3d8] sm:$0xff]  ;;  %v2421_v62 = vld [vmem:[%s3037_s1 + $0x310] sm:$0xff]  ;;  %v2435_v1 = vld [vmem:[%s3037_s1 + $0x380] sm:$0xff] }
  0x70   :  { %1734 = vmatpush.bf16.msra.mxu2 %v2404_v4  ;;  %1747 = vmatpush.bf16.msra.mxu3 %v2412_v9  ;;  %v2437_v4 = vld [vmem:[%s3037_s1 + $0x390] sm:$0xff]  ;;  %v2428_v9 = vld [vmem:[%s3037_s1 + $0x348] sm:$0xff]  ;;  %v2443_v20 = vld [vmem:[%s3037_s1 + $0x3c0] sm:$0xff] }
  0x71   :  { %v486_v30 = vsel %vm461_vm3, %v485_v28, %v443_v29 }
  0x72   :  { %v487_v50 = vsel %vm463_vm4, %v485_v28, %v486_v30 }
  0x73   :  { %1709 = vmatpush.bf16.msra.mxu0 %v2387_v21  ;;  %1722 = vmatpush.bf16.msra.mxu1 %v2395_v22  ;;  %v488_v31 = vsel %vm465_vm5, %v485_v28, %v487_v50 }
  0x74   :  { %1735 = vmatpush.bf16.msra.mxu2 %v2403_v5  ;;  %1748 = vmatpush.bf16.msra.mxu3 %v2411_v25  ;;  %v489_v33 = vsel %vm467_vm6, %v485_v28, %v488_v31 }
  0x75   :  { %v512_v27 = vmul.f32 0.25, %v489_v33 }
  0x76   :  { %v524_v32 = vld.sshfl [vmem:[#allocation1 + $0x20] sm:$0xff pattern:$0x73625140]  ;;  %v526_v35 = vld.sshfl [vmem:[#allocation1 + $0x30] sm:$0xff pattern:$0x73625140] }
  0x77   :  { %v558_v51 = vpack.c.bf16 %v524_v32, %v524_v32  ;;  %v560_v36 = vpack.c.bf16 %v526_v35, %v526_v35  ;;  %v525_v37 = vld.sshfl [vmem:[#allocation1 + $0x28] sm:$0xff pattern:$0x73625140]  ;;  %v527_v38 = vld.sshfl [vmem:[#allocation1 + $0x38] sm:$0xff pattern:$0x73625140] }
  0x78   :  { %v559_v40 = vpack.c.bf16 %v525_v37, %v525_v37  ;;  %v561_v41 = vpack.c.bf16 %v527_v38, %v527_v38  ;;  %529 = vst [vmem:[#allocation1 + $0x20] ss:$4 sm:$0xff] %v512_v27 }
  0x79   :  { %1658 = vmatmul.bf16.vlgmr.msrb.gmra.mxu0 %v558_v51  ;;  %1684 = vmatmul.bf16.vlgmr.msrb.gmra.mxu2 %v560_v36 }
  0x7a   :  { %1671 = vmatmul.bf16.vlgmr.msrb.gmra.mxu1 %v559_v40  ;;  %1697 = vmatmul.bf16.vlgmr.msrb.gmra.mxu3 %v561_v41 }
  0x7b   :  { %1754 = vmatpush.bf16.msrb.mxu0 %v2426_v34  ;;  %1767 = vmatpush.bf16.msrb.mxu1 %v2434_v45  ;;  %v2451_v34 = vld [vmem:[%s3039_s2] ss:$0 sm:$0xff] }
  0x7c   :  { %1780 = vmatpush.bf16.msrb.mxu2 %v2442_v42  ;;  %1793 = vmatpush.bf16.msrb.mxu3 %v2450_v18 }
  0x7f   :  { %1755 = vmatpush.bf16.msrb.mxu0 %v2425_v43  ;;  %1768 = vmatpush.bf16.msrb.mxu1 %v2433_v19  ;;  %v534_v21 = vld.sshfl [vmem:[#allocation1 + $0x20] sm:$0xff pattern:$0x73625140]  ;;  %v535_v22 = vld.sshfl [vmem:[#allocation1 + $0x28] sm:$0xff pattern:$0x73625140] }
  0x80   :  { %1781 = vmatpush.bf16.msrb.mxu2 %v2441_v44  ;;  %1794 = vmatpush.bf16.msrb.mxu3 %v2449_v10  ;;  %v536_v23 = vld.sshfl [vmem:[#allocation1 + $0x30] sm:$0xff pattern:$0x73625140]  ;;  %v537_v5 = vld.sshfl [vmem:[#allocation1 + $0x38] sm:$0xff pattern:$0x73625140]  ;;  %v566_v6 = vpack.c.bf16 %v534_v21, %v534_v21  ;;  %v567_v14 = vpack.c.bf16 %v535_v22, %v535_v22 }
  0x81   :  { %v568_v25 = vpack.c.bf16 %v536_v23, %v536_v23  ;;  %v569_v29 = vpack.c.bf16 %v537_v5, %v537_v5 }
  0x83   :  { %1756 = vmatpush.bf16.msrb.mxu0 %v2424_v39  ;;  %1769 = vmatpush.bf16.msrb.mxu1 %v2432_v46 }
  0x84   :  { %1782 = vmatpush.bf16.msrb.mxu2 %v2440_v0  ;;  %1795 = vmatpush.bf16.msrb.mxu3 %v2448_v47 }
  0x87   :  { %1757 = vmatpush.bf16.msrb.mxu0 %v2423_v55  ;;  %1770 = vmatpush.bf16.msrb.mxu1 %v2431_v2 }
  0x88   :  { %1783 = vmatpush.bf16.msrb.mxu2 %v2439_v24  ;;  %1796 = vmatpush.bf16.msrb.mxu3 %v2447_v56 }
  0x89   :  { %1710 = vmatmul.bf16.vlgmr.msra.gmra.mxu0 %v562_v58  ;;  %1736 = vmatmul.bf16.vlgmr.msra.gmra.mxu2 %v564_v63 }
  0x8a   :  { %1723 = vmatmul.bf16.vlgmr.msra.gmra.mxu1 %v563_v59  ;;  %1749 = vmatmul.bf16.vlgmr.msra.gmra.mxu3 %v565_v13 }
  0x8b   :  { %1758 = vmatpush.bf16.msrb.mxu0 %v2422_v60  ;;  %1771 = vmatpush.bf16.msrb.mxu1 %v2430_v54 }
  0x8c   :  { %1784 = vmatpush.bf16.msrb.mxu2 %v2438_v57  ;;  %1797 = vmatpush.bf16.msrb.mxu3 %v2446_v61 }
  0x8f   :  { %1759 = vmatpush.bf16.msrb.mxu0 %v2421_v62  ;;  %1772 = vmatpush.bf16.msrb.mxu1 %v2429_v3 }
  0x90   :  { %1785 = vmatpush.bf16.msrb.mxu2 %v2437_v4  ;;  %1798 = vmatpush.bf16.msrb.mxu3 %v2445_v7 }
  0x93   :  { %1760 = vmatpush.bf16.msrb.mxu0 %v2420_v8  ;;  %1773 = vmatpush.bf16.msrb.mxu1 %v2428_v9 }
  0x94   :  { %1786 = vmatpush.bf16.msrb.mxu2 %v2436_v11  ;;  %1799 = vmatpush.bf16.msrb.mxu3 %v2444_v15 }
  0x97   :  { %1761 = vmatpush.bf16.msrb.mxu0 %v2419_v16  ;;  %1774 = vmatpush.bf16.msrb.mxu1 %v2427_v17 }
  0x98   :  { %1787 = vmatpush.bf16.msrb.mxu2 %v2435_v1  ;;  %1800 = vmatpush.bf16.msrb.mxu3 %v2443_v20 }
  0x9a   :  { %1762 = vmatmul.bf16.vlgmr.msrb.gmra.mxu0 %v566_v6  ;;  %1775 = vmatmul.bf16.vlgmr.msrb.gmra.mxu1 %v567_v14 }
  0x9b   :  { %1788 = vmatmul.bf16.vlgmr.msrb.gmra.mxu2 %v568_v25  ;;  %1801 = vmatmul.bf16.vlgmr.msrb.gmra.mxu3 %v569_v29 }
  0xd2   :  { %v1607_v12 = vpop.f32.mrf.mxu0  ;;  %v1620_v26 = vpop.f32.mrf.mxu1 }
  0xd3   :  { %v1608_v45 = vadd.f32 %v2451_v34, %v1607_v12 }
  0xd5   :  { %v1621_v35 = vadd.f32 %v1620_v26, %v1608_v45 }
  0xd9   :  { %v1633_v28 = vpop.f32.mrf.mxu2  ;;  %v1646_v30 = vpop.f32.mrf.mxu3 }
  0xda   :  { %v1609_v50 = vpop.f32.mrf.mxu0  ;;  %v1622_v31 = vpop.f32.mrf.mxu1  ;;  %v1634_v36 = vadd.f32 %v1633_v28, %v1621_v35 }
  0xdc   :  { %v1647_v41 = vadd.f32 %v1646_v30, %v1634_v36 }
  0xe1   :  { %v1635_v33 = vpop.f32.mrf.mxu2  ;;  %v1648_v27 = vpop.f32.mrf.mxu3 }
  0xf6   :  { %v1659_v32 = vpop.f32.mrf.mxu0 }
  0xf7   :  { %v1672_v51 = vpop.f32.mrf.mxu1  ;;  %v1660_v18 = vadd.f32 %v1659_v32, %v1647_v41 }
  0xf9   :  { %v1673_v19 = vadd.f32 %v1672_v51, %v1660_v18 }
  0xfc   :  { %v1685_v37 = vpop.f32.mrf.mxu2 }
  0xfd   :  { %v1698_v38 = vpop.f32.mrf.mxu3  ;;  %v1686_v39 = vadd.f32 %v1685_v37, %v1673_v19 }
  0xfe   :  { %v1661_v40 = vpop.f32.mrf.mxu0 }
  0xff   :  { %v1674_v42 = vpop.f32.mrf.mxu1  ;;  %v1699_v0 = vadd.f32 %v1698_v38, %v1686_v39 }
 0x104   :  { %v1687_v43 = vpop.f32.mrf.mxu2 }
 0x105   :  { %v1700_v44 = vpop.f32.mrf.mxu3 }
 0x106   :  { %v1711_v10 = vpop.f32.mrf.mxu0 }
 0x107   :  { %v1724_v46 = vpop.f32.mrf.mxu1  ;;  %v1712_v48 = vadd.f32 %v1711_v10, %v1699_v0 }
 0x109   :  { %v1725_v55 = vadd.f32 %v1724_v46, %v1712_v48 }
 0x10c   :  { %v1737_v47 = vpop.f32.mrf.mxu2 }
 0x10d   :  { %v1750_v49 = vpop.f32.mrf.mxu3  ;;  %v1738_v2 = vadd.f32 %v1737_v47, %v1725_v55 }
 0x10e   :  { %v1713_v52 = vpop.f32.mrf.mxu0 }
 0x10f   :  { %v1726_v53 = vpop.f32.mrf.mxu1  ;;  %v1751_v58 = vadd.f32 %v1750_v49, %v1738_v2 }
 0x114   :  { %v1739_v24 = vpop.f32.mrf.mxu2 }
 0x115   :  { %v1752_v56 = vpop.f32.mrf.mxu3 }
 0x117   :  { %v1763_v63 = vpop.f32.mrf.mxu0  ;;  %v1776_v59 = vpop.f32.mrf.mxu1 }
 0x118   :  { %v1764_v13 = vadd.f32 %v1763_v63, %v1751_v58 }
 0x11a   :  { %v1777_v60 = vadd.f32 %v1776_v59, %v1764_v13 }
 0x11e   :  { %v1789_v54 = vpop.f32.mrf.mxu2  ;;  %v1802_v57 = vpop.f32.mrf.mxu3 }
 0x11f   :  { %v1790_v61 = vadd.f32 %v1789_v54, %v1777_v60  ;;  %v1765_v62 = vpop.f32.mrf.mxu0  ;;  %v1778_v3 = vpop.f32.mrf.mxu1 }
 0x121   :  { %v1803_v4 = vadd.f32 %v1802_v57, %v1790_v61 }
 0x123   :  { %1806 = vst [vmem:[%s3040_s3] sm:$0x3] %v1803_v4 }
 0x126   :  { %v1791_v7 = vpop.f32.mrf.mxu2  ;;  %v1804_v8 = vpop.f32.mrf.mxu3 }

</bundles_post_ra>
